<compile_context>
chip_gen: v6e
topology: v6e:2x2x1
jax: 0.10.0
libtpu: 0.0.40
codegen_flags: <defaults>
</compile_context>

<pallas_src>
import math

import jax
import jax.numpy as jnp
import numpy as np
from jax.experimental import pallas as pl
from jax.experimental.pallas import tpu as pltpu

# `layers` as used by Net(layers, dtype).  The forward pass implicitly requires
# layers[-2] == layers[1] + layers[-3]  (the torch.cat feeding fc[2*(hid-1)]).
LAYERS = [2, 16, 16, 32, 1]


def _round_up(a, b):
    return ((a + b - 1) // b) * b


def init_params(key, layers, dtype=jnp.float32):
    """Deterministic init mimicking torch.nn.Linear defaults, native (out,in) layout."""
    hid = len(layers) - 2
    dims = []
    for i in range(hid - 1):
        dims.append((layers[i + 1], layers[i]))
        dims.append((layers[i + 1], layers[i + 1]))
    dims.append((layers[hid], layers[hid]))
    dims.append((layers[-1], layers[-2]))

    params = []
    for (fout, fin) in dims:
        key, kw, kb = jax.random.split(key, 3)
        bound = 1.0 / math.sqrt(fin)
        W = jax.random.uniform(kw, (fout, fin), dtype, -bound, bound)
        b = jax.random.uniform(kb, (fout,), dtype, -bound, bound)
        params.append((W, b))
    return params


def net_forward(x, params, layers, tile_n_max=8192):
    """Pallas-TPU forward pass of Net; x is (N, layers[0]) -> (N, layers[-1])."""
    layers = list(layers)
    hid = len(layers) - 2
    n_h = 2 * (hid - 1)                 # Linear layers feeding the residual trunk
    N, d_in = x.shape
    Dh = layers[1]                      # hidden width of the trunk
    Dp = layers[-2]                     # width of the penultimate layer
    d_out = layers[-1]

    assert Dp == layers[1] + layers[hid - 1], \
        "Net forward requires layers[-2] == layers[1] + layers[-3]"
    for i in range(1, hid):
        assert layers[i] == Dh, "identity residuals require equal hidden widths"
    assert d_in <= Dh and d_in <= Dp

    f32 = jnp.float32
    x = x.astype(f32)

    # ---- pack parameters (few slabs -> few DMAs, resident across the grid) ----
    W0 = params[0][0].astype(f32)                                   # (Dh, d_in)
    b0 = params[0][1].astype(f32).reshape(Dh, 1)
    Whr = jnp.stack([params[k][0].astype(f32) for k in range(1, n_h)])          # (n_h-1, Dh, Dh)
    bhr = jnp.stack([params[k][1].astype(f32).reshape(Dh, 1) for k in range(1, n_h)])
    W4, b4 = params[n_h]                                            # penultimate (Dp, Dp)
    W5, b5 = params[n_h + 1]                                        # final (d_out, Dp)
    W4a = W4[:, :Dh].astype(f32)                                    # acts on tmp
    W4b = W4[:, Dh:].astype(f32)                                    # acts on mean(h0)
    b4c = b4.astype(f32).reshape(Dp, 1)
    W5m = W5.astype(f32)
    W5x = W5m[:, :d_in]                                             # eye(d_in,Dp) residual folded through fc[-1]
    b5c = b5.astype(f32).reshape(d_out, 1)

    # ---- tile / pad the point axis (lane axis) --------------------------------
    tile_n = _round_up(min(tile_n_max, _round_up(N, 128)), 128)
    Np = _round_up(N, tile_n)
    num_tiles = Np // tile_n
    xT = jnp.zeros((d_in, Np), f32).at[:, :N].set(x.T)

    vmem_limit = 48 * 1024 * 1024       # headroom-safe on v7x (64 MiB physical)

    # -------------------------- pass 0: residual trunk -------------------------
    def pass0_kernel(x_ref, W0_ref, b0_ref, Whr_ref, bhr_ref, psum_ref, tmp_ref):
        t = pl.program_id(0)
        xv = x_ref[...]                                             # (d_in, tile_n)

        h = jnp.sin(jnp.dot(W0_ref[...], xv, preferred_element_type=f32) + b0_ref[...])
        s1 = jnp.sin(jnp.dot(Whr_ref[0], h, preferred_element_type=f32) + bhr_ref[0])
        # tmp = s1 + zero-pad(x): add x only into the first d_in rows.
        tmp_ref[...] = s1
        tmp_ref[0:d_in, :] = s1[0:d_in, :] + xv
        h0 = tmp_ref[...]                                           # (Dh, tile_n)

        for i in range(1, hid - 1):
            hi = jnp.sin(jnp.dot(Whr_ref[2 * i - 1], h0, preferred_element_type=f32)
                         + bhr_ref[2 * i - 1])
            hi = jnp.sin(jnp.dot(Whr_ref[2 * i], hi, preferred_element_type=f32)
                         + bhr_ref[2 * i])
            h0 = hi + h0                        # h0 @ eye(Dh, Dh) == h0 exactly

        # Per-tile partial sum; only mask when this tile contains padded lanes
        # (at most the last tile), so the VALU select/iota is skipped otherwise.
        psum_ref[...] = jnp.sum(h0, axis=1, keepdims=True)

        @pl.when((t + 1) * tile_n > N)
        def _():
            lane = jax.lax.broadcasted_iota(jnp.int32, (1, tile_n), 1)
            valid = (lane + t * tile_n) < N
            psum_ref[...] = jnp.sum(jnp.where(valid, h0, 0.0), axis=1, keepdims=True)

    psum, tmpT = pl.pallas_call(
        pass0_kernel,
        out_shape=(jax.ShapeDtypeStruct((num_tiles, Dh, 1), f32),      # partial sums
                   jax.ShapeDtypeStruct((Dh, Np), f32)),               # tmp cache
        grid_spec=pltpu.PrefetchScalarGridSpec(
            num_scalar_prefetch=0,
            grid=(num_tiles,),
            in_specs=[
                pl.BlockSpec((d_in, tile_n), lambda t: (0, t)),        # x^T tiles
                pl.BlockSpec((Dh, d_in), lambda t: (0, 0)),            # W0
                pl.BlockSpec((Dh, 1), lambda t: (0, 0)),               # b0
                pl.BlockSpec((n_h - 1, Dh, Dh), lambda t: (0, 0, 0)),  # trunk W slab
                pl.BlockSpec((n_h - 1, Dh, 1), lambda t: (0, 0, 0)),   # trunk b slab
            ],
            out_specs=(
                pl.BlockSpec((None, Dh, 1), lambda t: (t, 0, 0)),      # per-tile sums
                pl.BlockSpec((Dh, tile_n), lambda t: (0, t)),          # tmp cache
            ),
        ),
        compiler_params=pltpu.CompilerParams(
            dimension_semantics=("parallel",),
            vmem_limit_bytes=vmem_limit),
        cost_estimate=pl.CostEstimate(
            flops=int(Np * (2 * Dh * d_in + 2 * Dh * Dh + (hid - 2) * 4 * Dh * Dh)),
            transcendentals=int(Np * (2 * Dh + (hid - 2) * 2 * Dh)),
            bytes_accessed=int(4 * ((d_in + Dh) * Np + W0.size + b0.size
                                    + Whr.size + bhr.size))),
    )(xT, W0, b0, Whr, bhr)

    # ---- tiny host-side reduction: mean over the true N points -> one bias ----
    mean = (jnp.sum(psum[:, :, 0], axis=0) / float(N)).reshape(Dh, 1)
    c4 = jnp.dot(W4b, mean) + b4c                                    # (Dp, 1)

    # ----------------- pass 1: penultimate + final Linear layers ---------------
    def pass1_kernel(x_ref, tmp_ref, W4a_ref, c4_ref, W5_ref, W5x_ref, b5_ref, out_ref):
        xv = x_ref[...]                                             # (d_in, tile_n)
        s = jnp.sin(jnp.dot(W4a_ref[...], tmp_ref[...], preferred_element_type=f32)
                    + c4_ref[...])                                  # (Dp, tile_n)
        # out = W5 @ (sin(pre) + zero-pad(x)) + b5
        #     = W5 @ sin(pre) + W5[:, :d_in] @ x + b5
        out_ref[...] = (jnp.dot(W5_ref[...], s, preferred_element_type=f32)
                        + jnp.dot(W5x_ref[...], xv, preferred_element_type=f32)
                        + b5_ref[...])                              # (d_out, tile_n)

    out = pl.pallas_call(
        pass1_kernel,
        out_shape=jax.ShapeDtypeStruct((d_out, Np), f32),
        grid_spec=pltpu.PrefetchScalarGridSpec(
            num_scalar_prefetch=0,
            grid=(num_tiles,),
            in_specs=[
                pl.BlockSpec((d_in, tile_n), lambda t: (0, t)),        # x^T tiles
                pl.BlockSpec((Dh, tile_n), lambda t: (0, t)),          # tmp cache tiles
                pl.BlockSpec((Dp, Dh), lambda t: (0, 0)),              # W4a
                pl.BlockSpec((Dp, 1), lambda t: (0, 0)),               # c4 = W4b@mean + b4
                pl.BlockSpec((d_out, Dp), lambda t: (0, 0)),           # W5
                pl.BlockSpec((d_out, d_in), lambda t: (0, 0)),         # W5[:, :d_in]
                pl.BlockSpec((d_out, 1), lambda t: (0, 0)),            # b5
            ],
            out_specs=pl.BlockSpec((d_out, tile_n), lambda t: (0, t)), # lane-dense
        ),
        compiler_params=pltpu.CompilerParams(
            dimension_semantics=("parallel",),
            vmem_limit_bytes=vmem_limit),
        cost_estimate=pl.CostEstimate(
            flops=int(Np * (2 * Dp * Dh + 2 * d_out * Dp + 2 * d_out * d_in)),
            transcendentals=int(Np * Dp),
            bytes_accessed=int(4 * ((d_in + Dh + d_out) * Np + W4a.size + c4.size
                                    + W5m.size + W5x.size + b5c.size))),
    )(xT, tmpT, W4a, c4, W5m, W5x, b5c)

    return out[:, :N].T                                              # (N, d_out)


def reference_forward(x, params, layers):
    """Pure-JAX transcription of Net.forward (for correctness check)."""
    hid = len(layers) - 2

    def lin(k, v):
        W, b = params[k]
        return v @ W.T + b

    h0 = jnp.sin(lin(0, x))
    h0 = jnp.sin(lin(1, h0)) + x @ jnp.eye(x.shape[-1], layers[1], dtype=x.dtype)
    tmp = h0
    for i in range(1, hid - 1):
        h = jnp.sin(lin(2 * i, h0))
        h = jnp.sin(lin(2 * i + 1, h))
        h0 = h + h0 @ jnp.eye(h0.shape[-1], layers[i + 1], dtype=x.dtype)
    h0 = jnp.mean(h0, axis=0, keepdims=True)
    h0 = jnp.ones((x.shape[0], 1), x.dtype) @ h0
    h0 = jnp.concatenate([tmp, h0], axis=1)
    h = (jnp.sin(lin(2 * (hid - 1), h0))
         + x @ jnp.eye(x.shape[-1], layers[-2], dtype=x.dtype))
    return lin(2 * hid - 1, h)


if __name__ == "__main__":
    key = jax.random.PRNGKey(0)
    kx, kp = jax.random.split(key)

    N = 300                                   # not a multiple of 128: exercises masking
    x = jax.random.normal(kx, (N, LAYERS[0]), dtype=jnp.float32)
    params = init_params(kp, LAYERS, dtype=jnp.float32)

    ref = jax.block_until_ready(reference_forward(x, params, LAYERS))

    # small tile: exercises the multi-tile partial-sum path + masked last tile
    out_small = jax.block_until_ready(net_forward(x, params, LAYERS, tile_n_max=128))
    # default (large) tile: single-tile path
    out_big = jax.block_until_ready(net_forward(x, params, LAYERS))

    for out in (out_small, out_big):
        assert out.shape == (N, LAYERS[-1])
        assert np.all(np.isfinite(np.asarray(out)))
        np.testing.assert_allclose(np.asarray(out), np.asarray(ref),
                                   rtol=1e-4, atol=1e-4)
    print("KERNEL_OK")
</pallas_src>

<mosaic_0001>
module attributes {stable_mosaic.version = 11 : i64} {
  func.func @pass0_kernel(%arg0: i32, %arg1: memref<2x128xf32, #tpu.memory_space<vmem>>, %arg2: memref<16x2xf32, #tpu.memory_space<vmem>>, %arg3: memref<16x1xf32, #tpu.memory_space<vmem>>, %arg4: memref<3x16x16xf32, #tpu.memory_space<vmem>>, %arg5: memref<3x16x1xf32, #tpu.memory_space<vmem>>, %arg6: memref<1x16x1xf32, #tpu.memory_space<vmem>>, %arg7: memref<16x128xf32, #tpu.memory_space<vmem>>) attributes {dimension_semantics = [#tpu.dimension_semantics<parallel>], iteration_bounds = array<i64: 3>, scalar_prefetch = 0 : i64, scratch_operands = 0 : i64, tpu.core_type = #tpu.core_type<tc>, window_params = [{transform_indices = @transform_0, window_bounds = array<i64: 2, 128>}, {pipeline_mode = #tpu.pipeline_mode<synchronous>, transform_indices = @transform_1, window_bounds = array<i64: 16, 2>}, {pipeline_mode = #tpu.pipeline_mode<synchronous>, transform_indices = @transform_2, window_bounds = array<i64: 16, 1>}, {pipeline_mode = #tpu.pipeline_mode<synchronous>, transform_indices = @transform_3, window_bounds = array<i64: 3, 16, 16>}, {pipeline_mode = #tpu.pipeline_mode<synchronous>, transform_indices = @transform_4, window_bounds = array<i64: 3, 16, 1>}, {transform_indices = @transform_5, window_bounds = array<i64: 1, 16, 1>}, {transform_indices = @transform_6, window_bounds = array<i64: 16, 128>}]} {
    %c0 = arith.constant 0 : index
    %c0_0 = arith.constant 0 : index
    %0 = vector.load %arg1[%c0, %c0_0] : memref<2x128xf32, #tpu.memory_space<vmem>>, vector<2x128xf32>
    %c0_1 = arith.constant 0 : index
    %c0_2 = arith.constant 0 : index
    %1 = vector.load %arg2[%c0_1, %c0_2] : memref<16x2xf32, #tpu.memory_space<vmem>>, vector<16x2xf32>
    %cst = arith.constant dense<0.000000e+00> : vector<16x128xf32>
    %2 = tpu.matmul %1, %0, %cst {dimension_numbers = #tpu.dot_dimension_numbers<[1], [0], [0], [1], [0, 0, 1, 1], [], []>} : vector<16x2xf32>, vector<2x128xf32>, vector<16x128xf32> -> vector<16x128xf32>
    %c0_3 = arith.constant 0 : index
    %c0_4 = arith.constant 0 : index
    %3 = vector.load %arg3[%c0_3, %c0_4] : memref<16x1xf32, #tpu.memory_space<vmem>>, vector<16x1xf32>
    %4 = vector.broadcast %3 : vector<16x1xf32> to vector<16x128xf32>
    %5 = arith.addf %2, %4 : vector<16x128xf32>
    %6 = math.sin %5 : vector<16x128xf32>
    %c0_5 = arith.constant 0 : index
    %c0_6 = arith.constant 0 : index
    %c0_7 = arith.constant 0 : index
    %7 = vector.load %arg4[%c0_5, %c0_6, %c0_7] : memref<3x16x16xf32, #tpu.memory_space<vmem>>, vector<1x16x16xf32>
    %8 = vector.shape_cast %7 : vector<1x16x16xf32> to vector<16x16xf32>
    %cst_8 = arith.constant dense<0.000000e+00> : vector<16x128xf32>
    %9 = tpu.matmul %8, %6, %cst_8 {dimension_numbers = #tpu.dot_dimension_numbers<[1], [0], [0], [1], [0, 0, 1, 1], [], []>} : vector<16x16xf32>, vector<16x128xf32>, vector<16x128xf32> -> vector<16x128xf32>
    %c0_9 = arith.constant 0 : index
    %c0_10 = arith.constant 0 : index
    %c0_11 = arith.constant 0 : index
    %10 = vector.load %arg5[%c0_9, %c0_10, %c0_11] : memref<3x16x1xf32, #tpu.memory_space<vmem>>, vector<1x16x1xf32>
    %11 = vector.shape_cast %10 : vector<1x16x1xf32> to vector<16x1xf32>
    %12 = vector.broadcast %11 : vector<16x1xf32> to vector<16x128xf32>
    %13 = arith.addf %9, %12 : vector<16x128xf32>
    %14 = math.sin %13 : vector<16x128xf32>
    %c0_12 = arith.constant 0 : index
    %c0_13 = arith.constant 0 : index
    %15 = vector.load %arg7[%c0_12, %c0_13] : memref<16x128xf32, #tpu.memory_space<vmem>>, vector<16x128xf32>
    tpu.vector_store %arg7[%c0_12, %c0_13], %14 {strides = array<i32>} : memref<16x128xf32, #tpu.memory_space<vmem>>, vector<16x128xf32>,
    %16 = vector.extract_strided_slice %14 {offsets = [0, 0], sizes = [2, 128], strides = [1, 1]} : vector<16x128xf32> to vector<2x128xf32>
    %17 = arith.addf %16, %0 : vector<2x128xf32>
    %c0_14 = arith.constant 0 : index
    %c0_15 = arith.constant 0 : index
    %18 = vector.load %arg7[%c0_14, %c0_15] : memref<16x128xf32, #tpu.memory_space<vmem>>, vector<2x128xf32>
    tpu.vector_store %arg7[%c0_14, %c0_15], %17 {strides = array<i32>} : memref<16x128xf32, #tpu.memory_space<vmem>>, vector<2x128xf32>,
    %c0_16 = arith.constant 0 : index
    %c0_17 = arith.constant 0 : index
    %19 = vector.load %arg7[%c0_16, %c0_17] : memref<16x128xf32, #tpu.memory_space<vmem>>, vector<16x128xf32>
    %c1 = arith.constant 1 : index
    %c0_18 = arith.constant 0 : index
    %c0_19 = arith.constant 0 : index
    %20 = vector.load %arg4[%c1, %c0_18, %c0_19] : memref<3x16x16xf32, #tpu.memory_space<vmem>>, vector<1x16x16xf32>
    %21 = vector.shape_cast %20 : vector<1x16x16xf32> to vector<16x16xf32>
    %cst_20 = arith.constant dense<0.000000e+00> : vector<16x128xf32>
    %22 = tpu.matmul %21, %19, %cst_20 {dimension_numbers = #tpu.dot_dimension_numbers<[1], [0], [0], [1], [0, 0, 1, 1], [], []>} : vector<16x16xf32>, vector<16x128xf32>, vector<16x128xf32> -> vector<16x128xf32>
    %c1_21 = arith.constant 1 : index
    %c0_22 = arith.constant 0 : index
    %c0_23 = arith.constant 0 : index
    %23 = vector.load %arg5[%c1_21, %c0_22, %c0_23] : memref<3x16x1xf32, #tpu.memory_space<vmem>>, vector<1x16x1xf32>
    %24 = vector.shape_cast %23 : vector<1x16x1xf32> to vector<16x1xf32>
    %25 = vector.broadcast %24 : vector<16x1xf32> to vector<16x128xf32>
    %26 = arith.addf %22, %25 : vector<16x128xf32>
    %27 = math.sin %26 : vector<16x128xf32>
    %c2 = arith.constant 2 : index
    %c0_24 = arith.constant 0 : index
    %c0_25 = arith.constant 0 : index
    %28 = vector.load %arg4[%c2, %c0_24, %c0_25] : memref<3x16x16xf32, #tpu.memory_space<vmem>>, vector<1x16x16xf32>
    %29 = vector.shape_cast %28 : vector<1x16x16xf32> to vector<16x16xf32>
    %cst_26 = arith.constant dense<0.000000e+00> : vector<16x128xf32>
    %30 = tpu.matmul %29, %27, %cst_26 {dimension_numbers = #tpu.dot_dimension_numbers<[1], [0], [0], [1], [0, 0, 1, 1], [], []>} : vector<16x16xf32>, vector<16x128xf32>, vector<16x128xf32> -> vector<16x128xf32>
    %c2_27 = arith.constant 2 : index
    %c0_28 = arith.constant 0 : index
    %c0_29 = arith.constant 0 : index
    %31 = vector.load %arg5[%c2_27, %c0_28, %c0_29] : memref<3x16x1xf32, #tpu.memory_space<vmem>>, vector<1x16x1xf32>
    %32 = vector.shape_cast %31 : vector<1x16x1xf32> to vector<16x1xf32>
    %33 = vector.broadcast %32 : vector<16x1xf32> to vector<16x128xf32>
    %34 = arith.addf %30, %33 : vector<16x128xf32>
    %35 = math.sin %34 : vector<16x128xf32>
    %36 = arith.addf %35, %19 : vector<16x128xf32>
    %cst_30 = arith.constant dense<0.000000e+00> : vector<16xf32>
    %37 = vector.multi_reduction <add>, %36, %cst_30 [1] : vector<16x128xf32> to vector<16xf32>
    %38 = vector.shape_cast %37 : vector<16xf32> to vector<16x1xf32>
    %c0_31 = arith.constant 0 : index
    %c0_32 = arith.constant 0 : index
    %c0_33 = arith.constant 0 : index
    %39 = vector.load %arg6[%c0_31, %c0_32, %c0_33] : memref<1x16x1xf32, #tpu.memory_space<vmem>>, vector<1x16x1xf32>
    %40 = vector.shape_cast %39 : vector<1x16x1xf32> to vector<16x1xf32>
    %41 = vector.shape_cast %38 : vector<16x1xf32> to vector<1x16x1xf32>
    tpu.vector_store %arg6[%c0_31, %c0_32, %c0_33], %41 {strides = array<i32>} : memref<1x16x1xf32, #tpu.memory_space<vmem>>, vector<1x16x1xf32>,
    %c1_i32 = arith.constant 1 : i32
    %42 = arith.addi %arg0, %c1_i32 : i32
    %c128_i32 = arith.constant 128 : i32
    %43 = arith.muli %42, %c128_i32 : i32
    %c300_i32 = arith.constant 300 : i32
    %44 = arith.cmpi sgt, %43, %c300_i32 : i32
    %45 = arith.extui %44 : i1 to i32
    %c0_i32 = arith.constant 0 : i32
    %46 = arith.cmpi ne, %45, %c0_i32 : i32
    scf.if %46 {
      %47 = tpu.iota {dimensions = array<i32: 1>} : vector<1x128xi32>
      %c128_i32_34 = arith.constant 128 : i32
      %48 = arith.muli %arg0, %c128_i32_34 : i32
      %49 = vector.broadcast %48 : i32 to vector<1x128xi32>
      %50 = arith.addi %47, %49 : vector<1x128xi32>
      %c300_i32_35 = arith.constant 300 : i32
      %51 = vector.broadcast %c300_i32_35 : i32 to vector<1x128xi32>
      %52 = arith.cmpi slt, %50, %51 : vector<1x128xi32>
      %cst_36 = arith.constant 0.000000e+00 : f32
      %53 = vector.shape_cast %52 : vector<1x128xi1> to vector<1x128xi1>
      %54 = vector.broadcast %53 : vector<1x128xi1> to vector<16x128xi1>
      %55 = vector.broadcast %cst_36 : f32 to vector<16x128xf32>
      %56 = arith.select %54, %36, %55 : vector<16x128xi1>, vector<16x128xf32>
      %cst_37 = arith.constant dense<0.000000e+00> : vector<16xf32>
      %57 = vector.multi_reduction <add>, %56, %cst_37 [1] : vector<16x128xf32> to vector<16xf32>
      %58 = vector.shape_cast %57 : vector<16xf32> to vector<16x1xf32>
      %c0_38 = arith.constant 0 : index
      %c0_39 = arith.constant 0 : index
      %c0_40 = arith.constant 0 : index
      %59 = vector.load %arg6[%c0_38, %c0_39, %c0_40] : memref<1x16x1xf32, #tpu.memory_space<vmem>>, vector<1x16x1xf32>
      %60 = vector.shape_cast %59 : vector<1x16x1xf32> to vector<16x1xf32>
      %61 = vector.shape_cast %58 : vector<16x1xf32> to vector<1x16x1xf32>
      tpu.vector_store %arg6[%c0_38, %c0_39, %c0_40], %61 {strides = array<i32>} : memref<1x16x1xf32, #tpu.memory_space<vmem>>, vector<1x16x1xf32>,
    } else {
    }
    return
  }
  func.func @transform_0(%arg0: i32) -> (i32, i32) {
    %c0_i32 = arith.constant 0 : i32
    %c0_i32_0 = arith.constant 0 : i32
    return %c0_i32, %arg0 : i32, i32
  }
  func.func @transform_1(%arg0: i32) -> (i32, i32) {
    %c0_i32 = arith.constant 0 : i32
    %c0_i32_0 = arith.constant 0 : i32
    %c0_i32_1 = arith.constant 0 : i32
    return %c0_i32, %c0_i32_0 : i32, i32
  }
  func.func @transform_2(%arg0: i32) -> (i32, i32) {
    %c0_i32 = arith.constant 0 : i32
    %c0_i32_0 = arith.constant 0 : i32
    %c0_i32_1 = arith.constant 0 : i32
    return %c0_i32, %c0_i32_0 : i32, i32
  }
  func.func @transform_3(%arg0: i32) -> (i32, i32, i32) {
    %c0_i32 = arith.constant 0 : i32
    %c0_i32_0 = arith.constant 0 : i32
    %c0_i32_1 = arith.constant 0 : i32
    %c0_i32_2 = arith.constant 0 : i32
    return %c0_i32, %c0_i32_0, %c0_i32_1 : i32, i32, i32
  }
  func.func @transform_4(%arg0: i32) -> (i32, i32, i32) {
    %c0_i32 = arith.constant 0 : i32
    %c0_i32_0 = arith.constant 0 : i32
    %c0_i32_1 = arith.constant 0 : i32
    %c0_i32_2 = arith.constant 0 : i32
    return %c0_i32, %c0_i32_0, %c0_i32_1 : i32, i32, i32
  }
  func.func @transform_5(%arg0: i32) -> (i32, i32, i32) {
    %c0_i32 = arith.constant 0 : i32
    %c0_i32_0 = arith.constant 0 : i32
    %c0_i32_1 = arith.constant 0 : i32
    return %arg0, %c0_i32, %c0_i32_0 : i32, i32, i32
  }
  func.func @transform_6(%arg0: i32) -> (i32, i32) {
    %c0_i32 = arith.constant 0 : i32
    %c0_i32_0 = arith.constant 0 : i32
    return %c0_i32, %arg0 : i32, i32
  }
}

</mosaic_0001>

<bundles_post_ra>
// kernel: tpu_custom_call.1
= control target key start
LH: loop header
LB: loop body
LE: loop exit
PB: predicated region body
PF: predicated region fallthrough
CT: control target
= control target key end

     0   :  { %12 = vsyncpa [#allocation3], 0  ;;  %s2539_s0 = inlined_call_operand.vmem [shape: f32[2,384], index: 0, kind: input, shape index: {}]   ;;  %s2540_s1 = inlined_call_operand.vmem [shape: f32[16,2], index: 1, kind: input, shape index: {}]   ;;  %s2541_s2 = inlined_call_operand.vmem [shape: f32[16,1], index: 2, kind: input, shape index: {}]   ;;  %s2542_s3 = inlined_call_operand.vmem [shape: f32[3,16,16], index: 3, kind: input, shape index: {}]   ;;  %s2543_s4 = inlined_call_operand.vmem [shape: f32[3,16,1], index: 4, kind: input, shape index: {}]   ;;  %s2544_s5 = inlined_call_operand.vmem [shape: f32[3,16,1], index: 5, kind: output, shape index: {0}]   ;;  %s2545_s6 = inlined_call_operand.hbm [shape: f32[16,384], index: 6, kind: output, shape index: {1}]  }
   0x1   :  { %14 = vsyncpa [#allocation3 + $0x1], 0  ;;  %s1959_s21 = smov 0   ;;  %s1961_s22 = smov 0  }
   0x2   :  { %s1963_s23 = smov 0   ;;  %s1965_s24 = smov 0  }
   0x3 LB: > { %s1980_s25 = sadd.s32 4294967295, %s1911_s24   ;;  %s1628_s26 = sadd.s32 4294967294, %s1911_s24   ;;  %s1911_s24 = sphi %s1965_s24, %s2559_s24   ;;  %s1907_s23 = sphi %s1963_s23, %s2558_s23   ;;  %s1903_s22 = sphi %s1961_s22, %s2557_s22   ;;  %s1899_s21 = sphi %s1959_s21, %s2556_s21  }
   0x4   : > { %s1984_s27 = sadd.s32 1, %s1911_s24   ;;  %s163_s28 = sadd.s32 1, %s1907_s23 }
   0x5   : > { %s160_s29 = ssub.s32 %s1911_s24, %s1984_s27  ;;  %p173_p0 = scmp.ne.s32.totalorder %s1907_s23, %s1903_s22 }
   0x6   : > { %p161_p1 = scmp.eq.s32.totalorder %s160_s29, 0  ;;  %p174_p2 = scmp.eq.s32.totalorder %s1980_s25, 2 }
   0x7   : > { %p179_p3 = scmp.ne.s32.totalorder %s1903_s22, %s1899_s21  ;;  %p180_p4 = scmp.eq.s32.totalorder %s1628_s26, 2 }
   0x8   : > { %s1995_s30 = scalar_select %p161_p1, %s1907_s23, %s163_s28  }
   0x9   : > { %p1997_p5 = por %p174_p2, %p173_p0  ;;  %p2001_p6 = por %p180_p4, %p179_p3 }
   0xa   : > { %p1631_p7 = scmp.ge.s32.totalorder %s1911_s24, 1  ;;  %p217_p8 = scmp.lt.s32.totalorder %s1911_s24, 4 }
   0xc   : > { %p218_p9 = pnand %p1631_p7, %p217_p8 }
   0xd   : > { %p251_p10 = scmp.lt.s32.totalorder (!%p218_p9), %s1980_s25, 2  ;;  %s248_s11 = sand.u32 (!%p218_p9), 1, %s1903_s22  }
   0xe   : > { %221 = sbr.rel (%p218_p9) target bundleno = 1510 (0x5e6), region = 40  ;;  %s1632_s12 = sshll.u32 (!%p218_p9), %s248_s11, 4 }
   0xf   : > { %s2277_s14 = scalar_lea.vmem (!%p218_p9), [#allocation2], %s1632_s12  ;;  %s1693_s26 = sshll.u32 (!%p218_p9), %s1980_s25, 7 }
  0x10   : > { %s1694_s28 = sadd.s32 (!%p218_p9), 128, %s1693_s26 }
  0x11   : > { %p1686_p11 = scmp.le.s32.totalorder (!%p218_p9), %s1694_s28, 300 }
  0x13   : > { %v261_v0 = vld [vmem:[%s2540_s1] sm:$0xff]  ;;  %vm275_vm0 = vcmask 15360   ;;  %v1913_v1 = vmov 0   ;;  %v264_v2 = vld [vmem:[%s2541_s2 + $0x8] sm:$0xff]  ;;  %s2016_s13 = scalar_select %p251_p10, %s1980_s25, 2  ;;  %vm282_vm1 = vcmask 1041408  }
  0x14   : > { %1712 = vmatprep.mubr.msk.f32.mxu0 %vm275_vm0, %v261_v0  ;;  %1817 = vset.pattern.permute.xlu0 %v1913_v1  ;;  %v263_v3 = vld [vmem:[%s2541_s2] sm:$0xff]  ;;  %v262_v5 = vld [vmem:[%s2540_s1 + $0x8] sm:$0xff]  ;;  %v1660_v6 = vld [vmem:[%s2543_s4 + $0x18] sm:$0xff]  ;;  %vm583_vm2 = vcmask 130048   ;;  %v1914_v37 = vmov 2102212464  }
  0x15   : > { %272 = vperm.xlu0 %1817, %v264_v2   ;;  %1818 = vset.pattern.permute.xlu1 %v1913_v1  ;;  %s1633_s16 = sshll.u32 %s2016_s13, 1  ;;  %v1673_v7 = vld [vmem:[%s2543_s4 + $0x20] sm:$0xff]  ;;  %v572_v10 = vld [vmem:[%s2543_s4 + $0x8] sm:$0xff]  ;;  %v1659_v11 = vld [vmem:[%s2543_s4 + $0x10] sm:$0xff]  ;;  %v1915_v42 = vmov 920167782  }
  0x16   : > { %s254_s19 = scalar_lea.vmem %s2539_s0, %s1633_s16  ;;  %v569_v8 = vld [vmem:[%s2542_s3] sm:$0xff]  ;;  %v1674_v12 = vld [vmem:[%s2543_s4 + $0x28] sm:$0xff]  ;;  %v1916_v45 = vmov 1326507024   ;;  %v1917_v49 = vmov 683565275  }
  0x17   : > { %v2025_v4 = vld [vmem:[%s254_s19] sm:$0x3]  ;;  %1719 = vmatprep.mubr.msk.f32.mxu1 %vm583_vm2, %v569_v8  ;;  %v1918_v51 = vmov 2475754826   ;;  %v1919_v57 = vmov 2131351028  }
  0x18   : > { %1710 = vmatprep.subr.msk.mxu0 %vm282_vm1, %v2025_v4  ;;  %v571_v9 = vld [vmem:[%s2543_s4] sm:$0xff]  ;;  %s1692_s29 = sshll.u32 %s2016_s13, 4 }
  0x19   : > { %267 = vperm.xlu0 %1817, %v263_v3   ;;  %1711 = vmatpush3.msk.msra.mxu0 %vm282_vm1, %v2025_v4  ;;  %s259_s12 = scalar_lea.vmem %s2544_s5, %s1692_s29 }
  0x1a   : > { %1713 = vmatmul.mubr.msk.f32.vlgmr.msra.gmra.mxu0 %vm275_vm0, %v262_v5  ;;  %575 = vperm.xlu1 %1818, %v571_v9  }
  0x1d   : > { %892 = vperm.xlu0 %1817, %v1660_v6  }
  0x1e   : > { %580 = vperm.xlu1 %1818, %v572_v10  }
  0x21   : > { %1192 = vperm.xlu0 %1817, %v1673_v7  }
  0x22   : > { %887 = vperm.xlu1 %1818, %v1659_v11  }
  0x26   : > { %1197 = vperm.xlu1 %1818, %v1674_v12  }
  0x90   : > { %v273_v13 = vpop.permute.xlu0 %272 }
  0x94   : > { %v268_v16 = vpop.permute.xlu0 %267 }
  0xda   : > { %v1714_v14 = vpop.f32.mrf.mxu0 }
  0xdb   : > { %v2055_v15 = vadd.f32 %v1714_v14, %v273_v13 }
  0xdc   : > { %v352_v17 = vpop.f32.mrf.mxu0 }
  0xdd   : > { %v468_v18 = vand.u32 2139095040, %v2055_v15  ;;  %v2058_v19 = vadd.f32 %v352_v17, %v268_v16  ;;  %v465_v26 = vand.u32 2147483647, %v2055_v15 }
  0xdf   : > { %v469_v20 = vshrl.u32 %v468_v18, 23  ;;  %v361_v21 = vand.u32 2147483647, %v2058_v19  ;;  %v364_v22 = vand.u32 2139095040, %v2058_v19  ;;  %v2067_v32 = vand.u32 8388607, %v465_v26 }
  0xe0   : > { %vm363_vm1 = vcmp.lt.s32.totalorder %v2058_v19, 0 }
  0xe1   : > { %v1643_v23 = vadd.s32 4294967169, %v469_v20  ;;  %v365_v24 = vshrl.u32 %v364_v22, 23  ;;  %v368_v25 = vand.u32 8388607, %v361_v21  ;;  %v473_v41 = vor.u32 8388608, %v2067_v32 }
  0xe3   : > { %v475_v27 = vadd.s32 1, %v1643_v23  ;;  %v1639_v28 = vadd.s32 4294967169, %v365_v24  ;;  %v369_v31 = vor.u32 8388608, %v368_v25 }
  0xe5   : > { %vm476_vm3 = vcmp.gt.s32.totalorder %v475_v27, 0  ;;  %v371_v29 = vadd.s32 1, %v1639_v28  ;;  %v2078_v40 = vshll.u32 %v369_v31, 8 }
  0xe6   : > { %v477_v30 = vsel %vm476_vm3, %v475_v27, 0  ;;  %vm2161_vm3 = vcmp.le.f32.partialorder %v361_v21, 0.7853982 }
  0xe7   : > { %v2069_v33 = vand.u32 31, %v477_v30  ;;  %vm372_vm4 = vcmp.gt.s32.totalorder %v371_v29, 0  ;;  %v2071_v34 = vshrl.u32 %v477_v30, 5 }
  0xe8   : > { %v373_v35 = vsel %vm372_vm4, %v371_v29, 0  ;;  %vm467_vm4 = vcmp.lt.s32.totalorder %v2055_v15, 0 }
  0xe9   : > { %v2074_v36 = vsub.s32 32, %v2069_v33  ;;  %v491_v38 = vshll.u32 %v1914_v37, %v2069_v33  ;;  %v375_v39 = vand.u32 31, %v373_v35  ;;  %v494_v44 = vshll.u32 %v1915_v42, %v2069_v33 }
  0xea   : > { %v374_v47 = vshrl.u32 %v373_v35, 5  ;;  %vm500_vm5 = vcmp.lt.s32.totalorder %v2071_v34, 4  ;;  %v482_v50 = vshll.u32 %v1917_v49, %v2069_v33  ;;  %v485_v53 = vshll.u32 %v1918_v51, %v2069_v33 }
  0xeb   : > { %v492_v43 = vshrl.u32 %v1915_v42, %v2074_v36  ;;  %v495_v46 = vshrl.u32 %v1916_v45, %v2074_v36  ;;  %v376_v48 = vsub.s32 32, %v375_v39  ;;  %v483_v52 = vshrl.u32 %v1918_v51, %v2074_v36 }
  0xec   : > { %v378_v55 = vshll.u32 %v1917_v49, %v375_v39  ;;  %v381_v56 = vshll.u32 %v1918_v51, %v375_v39  ;;  %v384_v58 = vshll.u32 %v1919_v57, %v375_v39  ;;  %v387_v63 = vshll.u32 %v1914_v37, %v375_v39 }
  0xed   : > { %v493_v54 = vor.u32 %v492_v43, %v491_v38  ;;  %v496_v59 = vor.u32 %v495_v46, %v494_v44  ;;  %v379_v60 = vshrl.u32 %v1918_v51, %v376_v48  ;;  %v382_v61 = vshrl.u32 %v1919_v57, %v376_v48 }
  0xee   : > { %v385_v62 = vshrl.u32 %v1914_v37, %v376_v48  ;;  %v388_v0 = vshrl.u32 %v1915_v42, %v376_v48  ;;  %v390_v1 = vshll.u32 %v1915_v42, %v375_v39  ;;  %v391_v2 = vshrl.u32 %v1916_v45, %v376_v48 }
  0xef   : > { %v377_v3 = vshrl.u32 %v1917_v49, %v376_v48  ;;  %v380_v5 = vor.u32 %v379_v60, %v378_v55  ;;  %v383_v6 = vor.u32 %v382_v61, %v381_v56  ;;  %vm393_vm6 = vcmp.lt.s32.totalorder %v374_v47, 1 }
  0xf0   : > { %v386_v7 = vor.u32 %v385_v62, %v384_v58  ;;  %v389_v8 = vor.u32 %v388_v0, %v387_v63  ;;  %v392_v9 = vor.u32 %v391_v2, %v390_v1  ;;  %vm394_vm7 = vcmp.lt.s32.totalorder %v374_v47, 2 }
  0xf1   : > { %vm395_vm8 = vcmp.lt.s32.totalorder %v374_v47, 3  ;;  %vm396_vm9 = vcmp.lt.s32.totalorder %v374_v47, 4  ;;  %v401_v10 = vsel %vm393_vm6, %v380_v5, %v383_v6  ;;  %v397_v12 = vsel %vm393_vm6, %v377_v3, %v380_v5 }
  0xf2   : > { %v405_v11 = vsel %vm393_vm6, %v383_v6, %v386_v7  ;;  %v398_v13 = vsel %vm396_vm9, %v386_v7, 2102212464  ;;  %v402_v14 = vsel %vm396_vm9, %v389_v8, 920167782  ;;  %v406_v16 = vsel %vm396_vm9, %v392_v9, 1326507024 }
  0xf3   : > { %v399_v17 = vsel %vm395_vm8, %v383_v6, %v398_v13  ;;  %v403_v18 = vsel %vm395_vm8, %v386_v7, %v402_v14  ;;  %v407_v20 = vsel %vm395_vm8, %v389_v8, %v406_v16  ;;  %v486_v22 = vshrl.u32 %v1919_v57, %v2074_v36 }
  0xf4   : > { %v510_v23 = vsel %vm500_vm5, %v496_v59, 1326507024  ;;  %v404_v24 = vsel %vm394_vm7, %v401_v10, %v403_v18  ;;  %v408_v25 = vsel %vm394_vm7, %v405_v11, %v407_v20  ;;  %v484_v27 = vor.u32 %v483_v52, %v482_v50 }
  0xf5   : > { %v2112_v28 = vmul.u32.u64.low %v2078_v40, %v408_v25  ;;  %v2113_v29 = vmul.u32.u64.high %v2078_v40, %v408_v25, %v2112_v28  ;;  %v2116_v30 = vmul.u32.u64.low %v2078_v40, %v404_v24  ;;  %v2117_v31 = vmul.u32.u64.high %v2078_v40, %v404_v24, %v2116_v30 }
  0xf6   : > { %v400_v35 = vsel %vm394_vm7, %v397_v12, %v399_v17  ;;  %v487_v38 = vor.u32 %v486_v22, %v485_v53  ;;  %v488_v39 = vshll.u32 %v1919_v57, %v2069_v33  ;;  %v489_v43 = vshrl.u32 %v1914_v37, %v2074_v36 }
  0xf7   : > { %v506_v44 = vsel %vm500_vm5, %v493_v54, 920167782  ;;  %vm497_vm10 = vcmp.lt.s32.totalorder %v2071_v34, 1  ;;  %vm499_vm11 = vcmp.lt.s32.totalorder %v2071_v34, 3  ;;  %v513_v50 = vshll.u32 %v473_v41, 8 }
  0xf8   : > { %v490_v46 = vor.u32 %v489_v43, %v488_v39  ;;  %v505_v48 = vsel %vm497_vm10, %v484_v27, %v487_v38  ;;  %v511_v47 = vsel %vm499_vm11, %v493_v54, %v510_v23  ;;  %v416_v33 = vmul.u32 %v2078_v40, %v400_v35 }
  0xf9   : > { %vm418_vm12 = vc.u32 %v2113_v29, %v2116_v30  ;;  %v419_v52 = vadd.s32 1, %v2117_v31  ;;  %v481_v53 = vshrl.u32 %v1917_v49, %v2074_v36  ;;  %vm498_vm13 = vcmp.lt.s32.totalorder %v2071_v34, 2 }
  0xfa   : > { %v502_v55 = vsel %vm500_vm5, %v490_v46, 2102212464  ;;  %v507_v54 = vsel %vm499_vm11, %v490_v46, %v506_v44  ;;  %v509_v56 = vsel %vm497_vm10, %v487_v38, %v490_v46  ;;  %v417_v22 = vadd.s32 %v2116_v30, %v2113_v29 }
  0xfb   : > { %v420_v32 = vsel %vm418_vm12, %v419_v52, %v2117_v31  ;;  %v501_v41 = vsel %vm497_vm10, %v481_v53, %v484_v27  ;;  %v508_v40 = vsel %vm498_vm13, %v505_v48, %v507_v54  ;;  %v512_v58 = vsel %vm498_vm13, %v509_v56, %v511_v47 }
  0xfc   : > { %v421_v59 = vadd.s32 %v420_v32, %v416_v33  ;;  %v503_v60 = vsel %vm499_vm11, %v487_v38, %v502_v55  ;;  %v2145_v61 = vmul.u32.u64.low %v513_v50, %v512_v58  ;;  %v2146_v36 = vmul.u32.u64.high %v513_v50, %v512_v58, %v2145_v61 }
  0xfd   : > { %v2148_v62 = vmul.u32.u64.low %v513_v50, %v508_v40  ;;  %v2149_v63 = vmul.u32.u64.high %v513_v50, %v508_v40, %v2148_v62  ;;  %v504_v1 = vsel %vm498_vm13, %v501_v41, %v503_v60  ;;  %vm466_vm5 = vcmp.le.f32.partialorder %v465_v26, 0.7853982 }
  0xfe   : > { %v422_v0 = vadd.s32 536870912, %v421_v59  ;;  %v520_v6 = vmul.u32 %v513_v50, %v504_v1  ;;  %vm557_vm12 = vweird.f32 %v2055_v15  ;;  %vm453_vm13 = vweird.f32 %v2058_v19 }
  0xff   : > { %vm522_vm14 = vc.u32 %v2146_v36, %v2148_v62  ;;  %v523_v3 = vadd.s32 1, %v2149_v63  ;;  %v521_v46 = vadd.s32 %v2148_v62, %v2146_v36 }
 0x100   : > { %v423_v2 = vshrl.u32 %v422_v0, 30 }
 0x101   : > { %v524_v7 = vsel %vm522_vm14, %v523_v3, %v2149_v63 }
 0x102   : > { %v424_v5 = vshll.u32 %v423_v2, 30  ;;  %v525_v34 = vadd.s32 %v524_v7, %v520_v6  ;;  %v447_v62 = vsub.s32 4, %v423_v2 }
 0x104   : > { %v425_v8 = vsub.s32 %v421_v59, %v424_v5  ;;  %v526_v10 = vadd.s32 536870912, %v525_v34  ;;  %v448_v1 = vsel %vm363_vm1, %v447_v62, %v423_v2 }
 0x105   : > { %v450_v6 = vsel %vm2161_vm3, 0, %v448_v1 }
 0x106   : > { %v427_v9 = vsub.s32 0, %v425_v8  ;;  %v527_v12 = vshrl.u32 %v526_v10, 30 }
 0x108   : > { %v1640_v11 = vmin.u32 %v427_v9, %v425_v8  ;;  %v528_v14 = vshll.u32 %v527_v12, 30  ;;  %v551_v0 = vsub.s32 4, %v527_v12 }
 0x10a   : > { %v429_v13 = vclz %v1640_v11  ;;  %v529_v17 = vsub.s32 %v525_v34, %v528_v14  ;;  %v552_v5 = vsel %vm467_vm4, %v551_v0, %v527_v12 }
 0x10b   : > { %v554_v7 = vsel %vm466_vm5, 0, %v552_v5 }
 0x10c   : > { %v1641_v16 = vadd.s32 4294967294, %v429_v13  ;;  %v531_v18 = vsub.s32 0, %v529_v17  ;;  %v558_v10 = vadd.s32 3, %v554_v7 }
 0x10e   : > { %vm1642_vm15 = vcmp.lt.s32.totalorder %v1641_v16, 0  ;;  %v1644_v25 = vmin.u32 %v531_v18, %v529_v17  ;;  %v559_v14 = vand.u32 3, %v558_v10 }
 0x10f   : > { %v432_v20 = vsel %vm1642_vm15, 0, %v1641_v16 }
 0x110   : > { %v433_v23 = vsub.s32 32, %v432_v20  ;;  %v437_v24 = vsub.s32 4294967266, %v432_v20  ;;  %v434_v27 = vshll.u32 %v425_v8, %v432_v20  ;;  %v533_v35 = vclz %v1644_v25 }
 0x111   : > { %v454_v8 = vadd.s32 3, %v450_v6  ;;  %vm564_vm8 = vcmp.eq.s32.totalorder %v559_v14, 2  ;;  %vm561_vm10 = vcmp.eq.s32.totalorder %v559_v14, 0  ;;  %vm560_vm11 = vcmp.lt.s32.totalorder %v559_v14, 2 }
 0x112   : > { %v435_v28 = vshrl.u32 %v417_v22, %v433_v23  ;;  %v438_v31 = vadd.s32 127, %v437_v24  ;;  %v1645_v43 = vadd.s32 4294967294, %v533_v35  ;;  %v1657_v35 = vld [vmem:[%s2542_s3 + $0x10] sm:$0xff] }
 0x113   : > { %v455_v11 = vand.u32 3, %v454_v8  ;;  %1726 = vmatprep.mubr.msk.f32.mxu0 %vm583_vm2, %v1657_v35 }
 0x114   : > { %v436_v38 = vor.u32 %v435_v28, %v434_v27  ;;  %v439_v39 = vshll.u32 %v438_v31, 23  ;;  %vm1646_vm0 = vcmp.lt.s32.totalorder %v1645_v43, 0  ;;  %v570_v31 = vld [vmem:[%s2542_s3 + $0x8] sm:$0xff] }
 0x115   : > { %v536_v48 = vsel %vm1646_vm0, 0, %v1645_v43  ;;  %vm457_vm6 = vcmp.eq.s32.totalorder %v455_v11, 0  ;;  %vm460_vm7 = vcmp.eq.s32.totalorder %v455_v11, 2  ;;  %vm456_vm9 = vcmp.lt.s32.totalorder %v455_v11, 2 }
 0x116   : > { %v440_v44 = vor.u32 4788187, %v439_v39  ;;  %v443_v50 = vcvt.s32.f32 %v436_v38  ;;  %v537_v33 = vsub.s32 32, %v536_v48  ;;  %v541_v52 = vsub.s32 4294967266, %v536_v48 }
 0x117   : > { %v538_v30 = vshll.u32 %v529_v17, %v536_v48 }
 0x118   : > { %v441_v47 = vand.u32 2147483647, %v440_v44  ;;  %v539_v53 = vshrl.u32 %v521_v46, %v537_v33  ;;  %v542_v55 = vadd.s32 127, %v541_v52 }
 0x11a   : > { %v444_v29 = vmul.f32 %v443_v50, %v441_v47  ;;  %v540_v56 = vor.u32 %v539_v53, %v538_v30  ;;  %v543_v32 = vshll.u32 %v542_v55, 23 }
 0x11c   : > { %v445_v54 = vxor.u32 2147483648, %v444_v29  ;;  %v544_v40 = vor.u32 4788187, %v543_v32  ;;  %v547_v61 = vcvt.s32.f32 %v540_v56 }
 0x11e   : > { %v446_v41 = vsel %vm363_vm1, %v445_v54, %v444_v29  ;;  %v545_v60 = vand.u32 2147483647, %v544_v40 }
 0x11f   : > { %v449_v59 = vsel %vm2161_vm3, %v2058_v19, %v446_v41 }
 0x120   : > { %1819 = vcosq.f32 %v449_v59  ;;  %v548_v36 = vmul.f32 %v547_v61, %v545_v60 }
 0x121   : > { %1821 = vsinq.f32 %v449_v59 }
 0x122   : > { %v549_v63 = vxor.u32 2147483648, %v548_v36 }
 0x124   : > { %v550_v21 = vsel %vm467_vm4, %v549_v63, %v548_v36 }
 0x125   : > { %v553_v3 = vsel %vm466_vm5, %v2055_v15, %v550_v21  ;;  %v576_v15 = vpop.permute.xlu1 %575 }
 0x126   : > { %1823 = vcosq.f32 %v553_v3 }
 0x127   : > { %1825 = vsinq.f32 %v553_v3 }
 0x129   : > { %v581_v19 = vpop.permute.xlu1 %580 }
 0x12d   : > { %v1820_v34 = vpop.eup %1819 }
 0x12e   : > { %v1822_v9 = vpop.eup %1821  ;;  %v461_v26 = vxor.u32 2147483648, %v1820_v34 }
 0x12f   : > { %v458_v13 = vxor.u32 2147483648, %v1822_v9 }
 0x130   : > { %v462_v17 = vsel %vm460_vm7, %v461_v26, %v1822_v9 }
 0x131   : > { %v459_v16 = vsel %vm457_vm6, %v1820_v34, %v458_v13 }
 0x132   : > { %v463_v23 = vsel %vm456_vm9, %v459_v16, %v462_v17 }
 0x133   : > { %v1824_v2 = vpop.eup %1823  ;;  %v464_v28 = vsel %vm453_vm13, nan, %v463_v23 }
 0x134   : > { %v1826_v18 = vpop.eup %1825  ;;  %v565_v12 = vxor.u32 2147483648, %v1824_v2 }
 0x135   : > { %v562_v20 = vxor.u32 2147483648, %v1826_v18 }
 0x136   : > { %v566_v22 = vsel %vm564_vm8, %v565_v12, %v1826_v18 }
 0x137   : > { %v563_v24 = vsel %vm561_vm10, %v1824_v2, %v562_v20 }
 0x138   : > { %v567_v25 = vsel %vm560_vm11, %v563_v24, %v566_v22 }
 0x139   : > { %v568_v27 = vsel %vm557_vm12, nan, %v567_v25 }
 0x13a   : > { %1715 = vmatprep.subr.mxu1 %v568_v27 }
 0x13b   : > { %1716 = vmatpush3.msra.mxu1 %v568_v27 }
 0x13c   : > { %1717 = vmatprep.subr.mxu1 %v464_v28 }
 0x13d   : > { %1718 = vmatpush3.msra.mxu1 %v464_v28 }
 0x13e   : > { %1720 = vmatmul.mubr.msk.f32.vlgmr.msra.gmra.mxu1 %vm583_vm2, %v570_v31 }
 0x1fe   : > { %v1721_v38 = vpop.f32.mrf.mxu1 }
 0x1ff   : > { %v2186_v39 = vadd.f32 %v1721_v38, %v581_v19 }
 0x200   : > { %v656_v43 = vpop.f32.mrf.mxu1 }
 0x201   : > { %v769_v44 = vand.u32 2147483647, %v2186_v39  ;;  %v772_v46 = vand.u32 2139095040, %v2186_v39  ;;  %v2190_v48 = vadd.f32 %v656_v43, %v576_v15  ;;  %vm771_vm13 = vcmp.lt.s32.totalorder %v2186_v39, 0 }
 0x203   : > { %v773_v47 = vshrl.u32 %v772_v46, 23  ;;  %v776_v50 = vand.u32 8388607, %v769_v44  ;;  %v668_v33 = vand.u32 2139095040, %v2190_v48  ;;  %v665_v29 = vand.u32 2147483647, %v2190_v48 }
 0x205   : > { %v1653_v52 = vadd.s32 4294967169, %v773_v47  ;;  %v669_v30 = vshrl.u32 %v668_v33, 23  ;;  %v777_v55 = vor.u32 8388608, %v776_v50  ;;  %v672_v56 = vand.u32 8388607, %v665_v29 }
 0x207   : > { %v779_v53 = vadd.s32 1, %v1653_v52  ;;  %v1649_v54 = vadd.s32 4294967169, %v669_v30  ;;  %v2198_v59 = vshll.u32 %v777_v55, 8  ;;  %v673_v36 = vor.u32 8388608, %v672_v56 }
 0x209   : > { %vm780_vm14 = vcmp.gt.s32.totalorder %v779_v53, 0  ;;  %v675_v41 = vadd.s32 1, %v1649_v54  ;;  %v713_v27 = vshll.u32 %v673_v36, 8 }
 0x20a   : > { %v781_v32 = vsel %vm780_vm14, %v779_v53, 0  ;;  %vm770_vm14 = vcmp.le.f32.partialorder %v769_v44, 0.7853982 }
 0x20b   : > { %v782_v40 = vshrl.u32 %v781_v32, 5  ;;  %v783_v58 = vand.u32 31, %v781_v32  ;;  %vm676_vm15 = vcmp.gt.s32.totalorder %v675_v41, 0 }
 0x20c   : > { %v677_v11 = vsel %vm676_vm15, %v675_v41, 0  ;;  %vm667_vm15 = vcmp.lt.s32.totalorder %v2190_v48, 0 }
 0x20d   : > { %v784_v60 = vsub.s32 32, %v783_v58  ;;  %v786_v61 = vshll.u32 %v1917_v49, %v783_v58  ;;  %v789_v62 = vshll.u32 %v1918_v51, %v783_v58  ;;  %v792_v63 = vshll.u32 %v1919_v57, %v783_v58 }
 0x20e   : > { %v795_v0 = vshll.u32 %v1914_v37, %v783_v58  ;;  %v798_v21 = vshll.u32 %v1915_v42, %v783_v58  ;;  %vm801_vm0 = vcmp.lt.s32.totalorder %v782_v40, 1  ;;  %vm803_vm1 = vcmp.lt.s32.totalorder %v782_v40, 3 }
 0x20f   : > { %v787_v1 = vshrl.u32 %v1918_v51, %v784_v60  ;;  %v790_v3 = vshrl.u32 %v1919_v57, %v784_v60  ;;  %v793_v5 = vshrl.u32 %v1914_v37, %v784_v60  ;;  %v785_v6 = vshrl.u32 %v1917_v49, %v784_v60 }
 0x210   : > { %v796_v7 = vshrl.u32 %v1915_v42, %v784_v60  ;;  %v799_v8 = vshrl.u32 %v1916_v45, %v784_v60  ;;  %vm804_vm3 = vcmp.lt.s32.totalorder %v782_v40, 4  ;;  %v679_v14 = vand.u32 31, %v677_v11 }
 0x211   : > { %v788_v34 = vor.u32 %v787_v1, %v786_v61  ;;  %v791_v9 = vor.u32 %v790_v3, %v789_v62  ;;  %v794_v10 = vor.u32 %v793_v5, %v792_v63  ;;  %vm802_vm4 = vcmp.lt.s32.totalorder %v782_v40, 2 }
 0x212   : > { %v797_v13 = vor.u32 %v796_v7, %v795_v0  ;;  %v800_v26 = vor.u32 %v799_v8, %v798_v21  ;;  %v680_v23 = vsub.s32 32, %v679_v14  ;;  %v678_v15 = vshrl.u32 %v677_v11, 5 }
 0x213   : > { %v805_v2 = vsel %vm801_vm0, %v785_v6, %v788_v34  ;;  %v806_v16 = vsel %vm804_vm3, %v794_v10, 2102212464  ;;  %v809_v17 = vsel %vm801_vm0, %v788_v34, %v791_v9  ;;  %v813_v18 = vsel %vm801_vm0, %v791_v9, %v794_v10 }
 0x214   : > { %v807_v12 = vsel %vm803_vm1, %v791_v9, %v806_v16  ;;  %v810_v20 = vsel %vm804_vm3, %v797_v13, 920167782  ;;  %v814_v22 = vsel %vm804_vm3, %v800_v26, 1326507024  ;;  %v682_v47 = vshll.u32 %v1917_v49, %v679_v14 }
 0x215   : > { %v811_v24 = vsel %vm803_vm1, %v794_v10, %v810_v20  ;;  %v815_v25 = vsel %vm803_vm1, %v797_v13, %v814_v22  ;;  %v808_v28 = vsel %vm802_vm4, %v805_v2, %v807_v12  ;;  %v683_v50 = vshrl.u32 %v1918_v51, %v680_v23 }
 0x216   : > { %v812_v31 = vsel %vm802_vm4, %v809_v17, %v811_v24  ;;  %v816_v35 = vsel %vm802_vm4, %v813_v18, %v815_v25  ;;  %v685_v33 = vshll.u32 %v1918_v51, %v679_v14  ;;  %v686_v52 = vshrl.u32 %v1919_v57, %v680_v23 }
 0x217   : > { %v2219_v19 = vmul.u32.u64.low %v2198_v59, %v816_v35  ;;  %v2220_v38 = vmul.u32.u64.high %v2198_v59, %v816_v35, %v2219_v19  ;;  %v2223_v43 = vmul.u32.u64.low %v2198_v59, %v812_v31  ;;  %v2224_v46 = vmul.u32.u64.high %v2198_v59, %v812_v31, %v2223_v43 }
 0x218   : > { %v688_v30 = vshll.u32 %v1919_v57, %v679_v14  ;;  %v689_v53 = vshrl.u32 %v1914_v37, %v680_v23  ;;  %v691_v55 = vshll.u32 %v1914_v37, %v679_v14  ;;  %v692_v54 = vshrl.u32 %v1915_v42, %v680_v23 }
 0x219   : > { %v684_v56 = vor.u32 %v683_v50, %v682_v47  ;;  %v687_v32 = vor.u32 %v686_v52, %v685_v33  ;;  %v694_v41 = vshll.u32 %v1915_v42, %v679_v14  ;;  %v695_v40 = vshrl.u32 %v1916_v45, %v680_v23 }
 0x21a   : > { %v824_v58 = vmul.u32 %v2198_v59, %v808_v28  ;;  %vm826_vm5 = vc.u32 %v2220_v38, %v2223_v43  ;;  %v827_v60 = vadd.s32 1, %v2224_v46  ;;  %v690_v61 = vor.u32 %v689_v53, %v688_v30 }
 0x21b   : > { %v681_v36 = vshrl.u32 %v1917_v49, %v680_v23  ;;  %v693_v62 = vor.u32 %v692_v54, %v691_v55  ;;  %v696_v63 = vor.u32 %v695_v40, %v694_v41  ;;  %vm697_vm6 = vcmp.lt.s32.totalorder %v678_v15, 1 }
 0x21c   : > { %v828_v0 = vsel %vm826_vm5, %v827_v60, %v2224_v46  ;;  %vm699_vm7 = vcmp.lt.s32.totalorder %v678_v15, 3  ;;  %vm700_vm8 = vcmp.lt.s32.totalorder %v678_v15, 4  ;;  %v705_v21 = vsel %vm697_vm6, %v684_v56, %v687_v32 }
 0x21d   : > { %v829_v1 = vadd.s32 %v828_v0, %v824_v58  ;;  %v702_v3 = vsel %vm700_vm8, %v690_v61, 2102212464  ;;  %v706_v5 = vsel %vm700_vm8, %v693_v62, 920167782  ;;  %v709_v59 = vsel %vm697_vm6, %v687_v32, %v690_v61 }
 0x21e   : > { %vm698_vm9 = vcmp.lt.s32.totalorder %v678_v15, 2  ;;  %v701_v6 = vsel %vm697_vm6, %v681_v36, %v684_v56  ;;  %v707_v7 = vsel %vm699_vm7, %v690_v61, %v706_v5  ;;  %v710_v8 = vsel %vm700_vm8, %v696_v63, 1326507024 }
 0x21f   : > { %v830_v34 = vadd.s32 536870912, %v829_v1  ;;  %v703_v9 = vsel %vm699_vm7, %v687_v32, %v702_v3  ;;  %v708_v10 = vsel %vm698_vm9, %v705_v21, %v707_v7  ;;  %v711_v11 = vsel %vm699_vm7, %v693_v62, %v710_v8 }
 0x220   : > { %v712_v13 = vsel %vm698_vm9, %v709_v59, %v711_v11  ;;  %v2243_v26 = vmul.u32.u64.low %v713_v27, %v708_v10  ;;  %v2244_v14 = vmul.u32.u64.high %v713_v27, %v708_v10, %v2243_v26  ;;  %v704_v18 = vsel %vm698_vm9, %v701_v6, %v703_v9 }
 0x221   : > { %v831_v2 = vshrl.u32 %v830_v34, 30  ;;  %v2246_v16 = vmul.u32.u64.low %v713_v27, %v712_v13  ;;  %v2247_v17 = vmul.u32.u64.high %v713_v27, %v712_v13, %v2246_v16  ;;  %v720_v23 = vmul.u32 %v713_v27, %v704_v18 }
 0x222   : > { %v723_v20 = vadd.s32 1, %v2244_v14  ;;  %v825_v52 = vadd.s32 %v2223_v43, %v2220_v38  ;;  %vm2262_vm0 = vcmp.le.f32.partialorder %v665_v29, 0.7853982  ;;  %vm861_vm5 = vweird.f32 %v2186_v39 }
 0x223   : > { %v832_v12 = vshll.u32 %v831_v2, 30  ;;  %vm722_vm10 = vc.u32 %v2247_v17, %v2243_v26  ;;  %v721_v21 = vadd.s32 %v2243_v26, %v2247_v17  ;;  %v855_v3 = vsub.s32 4, %v831_v2 }
 0x224   : > { %v724_v24 = vsel %vm722_vm10, %v723_v20, %v2244_v14  ;;  %vm757_vm9 = vweird.f32 %v2190_v48 }
 0x225   : > { %v833_v22 = vsub.s32 %v829_v1, %v832_v12  ;;  %v725_v28 = vadd.s32 %v724_v24, %v720_v23  ;;  %v856_v10 = vsel %vm771_vm13, %v855_v3, %v831_v2 }
 0x226   : > { %v858_v14 = vsel %vm770_vm14, 0, %v856_v10 }
 0x227   : > { %v835_v25 = vsub.s32 0, %v833_v22  ;;  %v726_v35 = vadd.s32 536870912, %v725_v28  ;;  %v862_v17 = vadd.s32 3, %v858_v14 }
 0x229   : > { %v1654_v31 = vmin.u32 %v835_v25, %v833_v22  ;;  %v727_v19 = vshrl.u32 %v726_v35, 30 }
 0x22b   : > { %v837_v15 = vclz %v1654_v31  ;;  %v728_v47 = vshll.u32 %v727_v19, 30  ;;  %v751_v44 = vsub.s32 4, %v727_v19 }
 0x22d   : > { %v1655_v46 = vadd.s32 4294967294, %v837_v15  ;;  %v729_v33 = vsub.s32 %v725_v28, %v728_v47  ;;  %v752_v23 = vsel %vm667_vm15, %v751_v44, %v727_v19 }
 0x22e   : > { %v754_v29 = vsel %vm2262_vm0, 0, %v752_v23 }
 0x22f   : > { %vm1656_vm11 = vcmp.lt.s32.totalorder %v1655_v46, 0  ;;  %v731_v53 = vsub.s32 0, %v729_v33  ;;  %v758_v47 = vadd.s32 3, %v754_v29 }
 0x230   : > { %v840_v50 = vsel %vm1656_vm11, 0, %v1655_v46 }
 0x231   : > { %v841_v30 = vsub.s32 32, %v840_v50  ;;  %v845_v27 = vsub.s32 4294967266, %v840_v50  ;;  %v842_v55 = vshll.u32 %v833_v22, %v840_v50  ;;  %v1650_v32 = vmin.u32 %v731_v53, %v729_v33 }
 0x232   : > { %v863_v22 = vand.u32 3, %v862_v17  ;;  %v759_v50 = vand.u32 3, %v758_v47 }
 0x233   : > { %v843_v54 = vshrl.u32 %v825_v52, %v841_v30  ;;  %v846_v56 = vadd.s32 127, %v845_v27  ;;  %v733_v58 = vclz %v1650_v32 }
 0x234   : > { %vm868_vm1 = vcmp.eq.s32.totalorder %v863_v22, 2  ;;  %vm865_vm3 = vcmp.eq.s32.totalorder %v863_v22, 0  ;;  %vm864_vm4 = vcmp.lt.s32.totalorder %v863_v22, 2  ;;  %vm764_vm6 = vcmp.eq.s32.totalorder %v759_v50, 2 }
 0x235   : > { %v844_v41 = vor.u32 %v843_v54, %v842_v55  ;;  %v847_v40 = vshll.u32 %v846_v56, 23  ;;  %v1651_v61 = vadd.s32 4294967294, %v733_v58  ;;  %vm761_vm7 = vcmp.eq.s32.totalorder %v759_v50, 0 }
 0x236   : > { %vm760_vm8 = vcmp.lt.s32.totalorder %v759_v50, 2 }
 0x237   : > { %v848_v60 = vor.u32 4788187, %v847_v40  ;;  %v851_v62 = vcvt.s32.f32 %v844_v41  ;;  %vm1652_vm12 = vcmp.lt.s32.totalorder %v1651_v61, 0  ;;  %v1658_v41 = vld [vmem:[%s2542_s3 + $0x18] sm:$0xff] }
 0x238   : > { %v736_v0 = vsel %vm1652_vm12, 0, %v1651_v61 }
 0x239   : > { %v849_v36 = vand.u32 2147483647, %v848_v60  ;;  %v737_v38 = vsub.s32 32, %v736_v0  ;;  %v741_v43 = vsub.s32 4294967266, %v736_v0  ;;  %v738_v5 = vshll.u32 %v729_v33, %v736_v0  ;;  %v888_v60 = vpop.permute.xlu1 %887 }
 0x23b   : > { %v852_v63 = vmul.f32 %v851_v62, %v849_v36  ;;  %v739_v59 = vshrl.u32 %v721_v21, %v737_v38  ;;  %v742_v6 = vadd.s32 127, %v741_v43 }
 0x23d   : > { %v853_v1 = vxor.u32 2147483648, %v852_v63  ;;  %v740_v34 = vor.u32 %v739_v59, %v738_v5  ;;  %v743_v9 = vshll.u32 %v742_v6, 23 }
 0x23f   : > { %v854_v7 = vsel %vm771_vm13, %v853_v1, %v852_v63  ;;  %v744_v11 = vor.u32 4788187, %v743_v9  ;;  %v747_v26 = vcvt.s32.f32 %v740_v34 }
 0x240   : > { %v857_v8 = vsel %vm770_vm14, %v2186_v39, %v854_v7 }
 0x241   : > { %1827 = vcosq.f32 %v857_v8  ;;  %v745_v13 = vand.u32 2147483647, %v744_v11 }
 0x242   : > { %1829 = vsinq.f32 %v857_v8 }
 0x243   : > { %v748_v16 = vmul.f32 %v747_v26, %v745_v13 }
 0x245   : > { %v749_v18 = vxor.u32 2147483648, %v748_v16 }
 0x247   : > { %v750_v2 = vsel %vm667_vm15, %v749_v18, %v748_v16 }
 0x248   : > { %v753_v20 = vsel %vm2262_vm0, %v2190_v48, %v750_v2  ;;  %v1671_v48 = vld [vmem:[%s2542_s3 + $0x20] sm:$0xff] }
 0x249   : > { %1831 = vcosq.f32 %v753_v20  ;;  %1733 = vmatprep.mubr.msk.f32.mxu1 %vm583_vm2, %v1671_v48 }
 0x24a   : > { %1833 = vsinq.f32 %v753_v20 }
 0x24e   : > { %v1828_v24 = vpop.eup %1827 }
 0x24f   : > { %v1830_v25 = vpop.eup %1829  ;;  %v869_v28 = vxor.u32 2147483648, %v1828_v24 }
 0x250   : > { %v866_v31 = vxor.u32 2147483648, %v1830_v25 }
 0x251   : > { %v870_v35 = vsel %vm868_vm1, %v869_v28, %v1830_v25 }
 0x252   : > { %v867_v15 = vsel %vm865_vm3, %v1828_v24, %v866_v31 }
 0x253   : > { %v871_v46 = vsel %vm864_vm4, %v867_v15, %v870_v35 }
 0x254   : > { %v2275_v19 = vsel %vm861_vm5, nan, %v871_v46 }
 0x255   : > { %874 = vst [vmem:[%s2277_s14 + $0x8] sm:$0xff] %v2275_v19  ;;  %1722 = vmatprep.subr.mxu0 %v2275_v19 }
 0x256   : > { %1723 = vmatpush3.msra.mxu0 %v2275_v19  ;;  %v1832_v33 = vpop.eup %1831 }
 0x257   : > { %v1834_v52 = vpop.eup %1833  ;;  %v765_v39 = vxor.u32 2147483648, %v1832_v33 }
 0x258   : > { %v762_v30 = vxor.u32 2147483648, %v1834_v52 }
 0x259   : > { %v766_v27 = vsel %vm764_vm6, %v765_v39, %v1834_v52 }
 0x25a   : > { %v763_v53 = vsel %vm761_vm7, %v1832_v33, %v762_v30 }
 0x25b   : > { %v767_v55 = vsel %vm760_vm8, %v763_v53, %v766_v27 }
 0x25c   : > { %v768_v54 = vsel %vm757_vm9, nan, %v767_v55 }
 0x25d   : > { %v875_v56 = vadd.f32 %v768_v54, %v2025_v4  ;;  %873 = vst [vmem:[%s2277_s14] sm:$0xff] %v768_v54  ;;  %v893_v4 = vpop.permute.xlu0 %892 }
 0x25f   : > { %876 = vst [vmem:[%s2277_s14] sm:$0x3] %v875_v56 }
 0x266   : > { %v2288_v32 = vld [vmem:[%s2277_s14] sm:$0xff] }
 0x267   : > { %1724 = vmatprep.subr.mxu0 %v2288_v32 }
 0x268   : > { %1725 = vmatpush3.msra.mxu0 %v2288_v32 }
 0x269   : > { %1727 = vmatmul.mubr.msk.f32.vlgmr.msra.gmra.mxu0 %vm583_vm2, %v1658_v41 }
 0x329   : > { %v1728_v40 = vpop.f32.mrf.mxu0 }
 0x32a   : > { %v2300_v58 = vadd.f32 %v1728_v40, %v893_v4 }
 0x32b   : > { %v967_v61 = vpop.f32.mrf.mxu0 }
 0x32c   : > { %v1080_v36 = vand.u32 2147483647, %v2300_v58  ;;  %v1083_v62 = vand.u32 2139095040, %v2300_v58  ;;  %v2304_v63 = vadd.f32 %v967_v61, %v888_v60  ;;  %vm1082_vm9 = vcmp.lt.s32.totalorder %v2300_v58, 0 }
 0x32e   : > { %v1084_v0 = vshrl.u32 %v1083_v62, 23  ;;  %v1087_v21 = vand.u32 8388607, %v1080_v36  ;;  %v979_v38 = vand.u32 2139095040, %v2304_v63  ;;  %v976_v1 = vand.u32 2147483647, %v2304_v63 }
 0x330   : > { %v1667_v43 = vadd.s32 4294967169, %v1084_v0  ;;  %v980_v3 = vshrl.u32 %v979_v38, 23  ;;  %v1088_v59 = vor.u32 8388608, %v1087_v21  ;;  %v983_v7 = vand.u32 8388607, %v976_v1 }
 0x332   : > { %v1090_v5 = vadd.s32 1, %v1667_v43  ;;  %v1663_v6 = vadd.s32 4294967169, %v980_v3  ;;  %v2312_v11 = vshll.u32 %v1088_v59, 8  ;;  %v984_v14 = vor.u32 8388608, %v983_v7 }
 0x334   : > { %vm1091_vm10 = vcmp.gt.s32.totalorder %v1090_v5, 0  ;;  %v986_v34 = vadd.s32 1, %v1663_v6  ;;  %v1024_v56 = vshll.u32 %v984_v14, 8 }
 0x335   : > { %v1092_v8 = vsel %vm1091_vm10, %v1090_v5, 0  ;;  %vm1081_vm10 = vcmp.le.f32.partialorder %v1080_v36, 0.7853982 }
 0x336   : > { %v1093_v9 = vshrl.u32 %v1092_v8, 5  ;;  %v1094_v10 = vand.u32 31, %v1092_v8  ;;  %vm987_vm11 = vcmp.gt.s32.totalorder %v986_v34, 0 }
 0x337   : > { %v988_v29 = vsel %vm987_vm11, %v986_v34, 0  ;;  %vm978_vm11 = vcmp.lt.s32.totalorder %v2304_v63, 0 }
 0x338   : > { %v1095_v13 = vsub.s32 32, %v1094_v10  ;;  %v1097_v26 = vshll.u32 %v1917_v49, %v1094_v10  ;;  %v1100_v16 = vshll.u32 %v1918_v51, %v1094_v10  ;;  %v1103_v17 = vshll.u32 %v1919_v57, %v1094_v10 }
 0x339   : > { %v1106_v18 = vshll.u32 %v1914_v37, %v1094_v10  ;;  %v1109_v44 = vshll.u32 %v1915_v42, %v1094_v10  ;;  %vm1112_vm12 = vcmp.lt.s32.totalorder %v1093_v9, 1  ;;  %vm1114_vm13 = vcmp.lt.s32.totalorder %v1093_v9, 3 }
 0x33a   : > { %v1098_v12 = vshrl.u32 %v1918_v51, %v1095_v13  ;;  %v1101_v2 = vshrl.u32 %v1919_v57, %v1095_v13  ;;  %v1104_v20 = vshrl.u32 %v1914_v37, %v1095_v13  ;;  %v1096_v22 = vshrl.u32 %v1917_v49, %v1095_v13 }
 0x33b   : > { %v1107_v23 = vshrl.u32 %v1915_v42, %v1095_v13  ;;  %v1110_v24 = vshrl.u32 %v1916_v45, %v1095_v13  ;;  %vm1115_vm14 = vcmp.lt.s32.totalorder %v1093_v9, 4  ;;  %v990_v46 = vand.u32 31, %v988_v29 }
 0x33c   : > { %v1099_v25 = vor.u32 %v1098_v12, %v1097_v26  ;;  %v1102_v28 = vor.u32 %v1101_v2, %v1100_v16  ;;  %v1105_v31 = vor.u32 %v1104_v20, %v1103_v17  ;;  %vm1113_vm15 = vcmp.lt.s32.totalorder %v1093_v9, 2 }
 0x33d   : > { %v1108_v35 = vor.u32 %v1107_v23, %v1106_v18  ;;  %v1111_v15 = vor.u32 %v1110_v24, %v1109_v44  ;;  %v991_v53 = vsub.s32 32, %v990_v46  ;;  %v989_v40 = vshrl.u32 %v988_v29, 5 }
 0x33e   : > { %v1116_v47 = vsel %vm1112_vm12, %v1096_v22, %v1099_v25  ;;  %v1117_v50 = vsel %vm1115_vm14, %v1105_v31, 2102212464  ;;  %v1120_v33 = vsel %vm1112_vm12, %v1099_v25, %v1102_v28  ;;  %v1124_v52 = vsel %vm1112_vm12, %v1102_v28, %v1105_v31 }
 0x33f   : > { %v1118_v39 = vsel %vm1114_vm13, %v1102_v28, %v1117_v50  ;;  %v1121_v30 = vsel %vm1115_vm14, %v1108_v35, 920167782  ;;  %v1125_v27 = vsel %vm1115_vm14, %v1111_v15, 1326507024  ;;  %v993_v21 = vshll.u32 %v1917_v49, %v990_v46 }
 0x340   : > { %v1122_v55 = vsel %vm1114_vm13, %v1105_v31, %v1121_v30  ;;  %v1126_v54 = vsel %vm1114_vm13, %v1108_v35, %v1125_v27  ;;  %v1119_v41 = vsel %vm1113_vm15, %v1116_v47, %v1118_v39  ;;  %v994_v38 = vshrl.u32 %v1918_v51, %v991_v53 }
 0x341   : > { %v1123_v48 = vsel %vm1113_vm15, %v1120_v33, %v1122_v55  ;;  %v1127_v4 = vsel %vm1113_vm15, %v1124_v52, %v1126_v54  ;;  %v996_v43 = vshll.u32 %v1918_v51, %v990_v46  ;;  %v997_v3 = vshrl.u32 %v1919_v57, %v991_v53 }
 0x342   : > { %v2333_v60 = vmul.u32.u64.low %v2312_v11, %v1127_v4  ;;  %v2334_v61 = vmul.u32.u64.high %v2312_v11, %v1127_v4, %v2333_v60  ;;  %v2337_v62 = vmul.u32.u64.low %v2312_v11, %v1123_v48  ;;  %v2338_v0 = vmul.u32.u64.high %v2312_v11, %v1123_v48, %v2337_v62 }
 0x343   : > { %v999_v5 = vshll.u32 %v1919_v57, %v990_v46  ;;  %v1000_v59 = vshrl.u32 %v1914_v37, %v991_v53  ;;  %v1002_v6 = vshll.u32 %v1914_v37, %v990_v46  ;;  %v1003_v7 = vshrl.u32 %v1915_v42, %v991_v53 }
 0x344   : > { %v995_v8 = vor.u32 %v994_v38, %v993_v21  ;;  %v998_v34 = vor.u32 %v997_v3, %v996_v43  ;;  %v1005_v9 = vshll.u32 %v1915_v42, %v990_v46  ;;  %v1006_v10 = vshrl.u32 %v1916_v45, %v991_v53 }
 0x345   : > { %v1135_v13 = vmul.u32 %v2312_v11, %v1119_v41  ;;  %vm1137_vm0 = vc.u32 %v2334_v61, %v2337_v62  ;;  %v1138_v26 = vadd.s32 1, %v2338_v0  ;;  %v1001_v14 = vor.u32 %v1000_v59, %v999_v5 }
 0x346   : > { %v992_v16 = vshrl.u32 %v1917_v49, %v991_v53  ;;  %v1004_v17 = vor.u32 %v1003_v7, %v1002_v6  ;;  %v1007_v18 = vor.u32 %v1006_v10, %v1005_v9  ;;  %vm1008_vm1 = vcmp.lt.s32.totalorder %v989_v40, 1 }
 0x347   : > { %v1139_v44 = vsel %vm1137_vm0, %v1138_v26, %v2338_v0  ;;  %vm1010_vm3 = vcmp.lt.s32.totalorder %v989_v40, 3  ;;  %vm1011_vm4 = vcmp.lt.s32.totalorder %v989_v40, 4  ;;  %v1016_v12 = vsel %vm1008_vm1, %v995_v8, %v998_v34 }
 0x348   : > { %v1140_v2 = vadd.s32 %v1139_v44, %v1135_v13  ;;  %v1013_v20 = vsel %vm1011_vm4, %v1001_v14, 2102212464  ;;  %v1017_v22 = vsel %vm1011_vm4, %v1004_v17, 920167782  ;;  %v1020_v11 = vsel %vm1008_vm1, %v998_v34, %v1001_v14 }
 0x349   : > { %vm1009_vm5 = vcmp.lt.s32.totalorder %v989_v40, 2  ;;  %v1012_v23 = vsel %vm1008_vm1, %v992_v16, %v995_v8  ;;  %v1018_v24 = vsel %vm1010_vm3, %v1001_v14, %v1017_v22  ;;  %v1021_v25 = vsel %vm1011_vm4, %v1007_v18, 1326507024 }
 0x34a   : > { %v1141_v28 = vadd.s32 536870912, %v1140_v2  ;;  %v1014_v31 = vsel %vm1010_vm3, %v998_v34, %v1013_v20  ;;  %v1019_v29 = vsel %vm1009_vm5, %v1016_v12, %v1018_v24  ;;  %v1022_v35 = vsel %vm1010_vm3, %v1004_v17, %v1021_v25 }
 0x34b   : > { %v1023_v15 = vsel %vm1009_vm5, %v1020_v11, %v1022_v35  ;;  %v2357_v46 = vmul.u32.u64.low %v1024_v56, %v1019_v29  ;;  %v2358_v47 = vmul.u32.u64.high %v1024_v56, %v1019_v29, %v2357_v46  ;;  %v1015_v39 = vsel %vm1009_vm5, %v1012_v23, %v1014_v31 }
 0x34c   : > { %v1142_v50 = vshrl.u32 %v1141_v28, 30  ;;  %v2360_v33 = vmul.u32.u64.low %v1024_v56, %v1023_v15  ;;  %v2361_v52 = vmul.u32.u64.high %v1024_v56, %v1023_v15, %v2360_v33  ;;  %v1031_v55 = vmul.u32 %v1024_v56, %v1015_v39 }
 0x34d   : > { %v1034_v27 = vadd.s32 1, %v2358_v47  ;;  %v1136_v5 = vadd.s32 %v2337_v62, %v2334_v61  ;;  %vm2376_vm12 = vcmp.le.f32.partialorder %v976_v1, 0.7853982  ;;  %vm1172_vm0 = vweird.f32 %v2300_v58 }
 0x34e   : > { %v1143_v30 = vshll.u32 %v1142_v50, 30  ;;  %vm1033_vm6 = vc.u32 %v2361_v52, %v2357_v46  ;;  %v1166_v24 = vsub.s32 4, %v1142_v50  ;;  %vm1068_vm5 = vweird.f32 %v2304_v63 }
 0x34f   : > { %v1035_v54 = vsel %vm1033_vm6, %v1034_v27, %v2358_v47 }
 0x350   : > { %v1144_v53 = vsub.s32 %v1140_v2, %v1143_v30  ;;  %v1036_v48 = vadd.s32 %v1035_v54, %v1031_v55  ;;  %v1032_v2 = vadd.s32 %v2357_v46, %v2361_v52  ;;  %v1167_v15 = vsel %vm1082_vm9, %v1166_v24, %v1142_v50 }
 0x351   : > { %v1169_v52 = vsel %vm1081_vm10, 0, %v1167_v15 }
 0x352   : > { %v1146_v41 = vsub.s32 0, %v1144_v53  ;;  %v1037_v40 = vadd.s32 536870912, %v1036_v48  ;;  %v1173_v30 = vadd.s32 3, %v1169_v52 }
 0x354   : > { %v1668_v4 = vmin.u32 %v1146_v41, %v1144_v53  ;;  %v1038_v0 = vshrl.u32 %v1037_v40, 30  ;;  %v1174_v55 = vand.u32 3, %v1173_v30 }
 0x356   : > { %v1148_v60 = vclz %v1668_v4  ;;  %v1039_v38 = vshll.u32 %v1038_v0, 30  ;;  %v1062_v27 = vsub.s32 4, %v1038_v0  ;;  %vm1179_vm13 = vcmp.eq.s32.totalorder %v1174_v55, 2 }
 0x357   : > { %vm1176_vm14 = vcmp.eq.s32.totalorder %v1174_v55, 0  ;;  %vm1175_vm15 = vcmp.lt.s32.totalorder %v1174_v55, 2 }
 0x358   : > { %v1669_v21 = vadd.s32 4294967294, %v1148_v60  ;;  %v1040_v43 = vsub.s32 %v1036_v48, %v1039_v38  ;;  %v1063_v54 = vsel %vm978_vm11, %v1062_v27, %v1038_v0 }
 0x359   : > { %v1065_v40 = vsel %vm2376_vm12, 0, %v1063_v54 }
 0x35a   : > { %vm1670_vm7 = vcmp.lt.s32.totalorder %v1669_v21, 0  ;;  %v1042_v6 = vsub.s32 0, %v1040_v43  ;;  %v1069_v38 = vadd.s32 3, %v1065_v40 }
 0x35b   : > { %v1151_v3 = vsel %vm1670_vm7, 0, %v1669_v21 }
 0x35c   : > { %v1152_v59 = vsub.s32 32, %v1151_v3  ;;  %v1156_v56 = vsub.s32 4294967266, %v1151_v3  ;;  %v1153_v7 = vshll.u32 %v1144_v53, %v1151_v3  ;;  %v1664_v9 = vmin.u32 %v1042_v6, %v1040_v43 }
 0x35d   : > { %v1070_v0 = vand.u32 3, %v1069_v38 }
 0x35e   : > { %v1154_v8 = vshrl.u32 %v1136_v5, %v1152_v59  ;;  %v1157_v34 = vadd.s32 127, %v1156_v56  ;;  %v1044_v26 = vclz %v1664_v9 }
 0x35f   : > { %vm1075_vm1 = vcmp.eq.s32.totalorder %v1070_v0, 2  ;;  %vm1072_vm3 = vcmp.eq.s32.totalorder %v1070_v0, 0  ;;  %vm1071_vm4 = vcmp.lt.s32.totalorder %v1070_v0, 2 }
 0x360   : > { %v1155_v10 = vor.u32 %v1154_v8, %v1153_v7  ;;  %v1158_v13 = vshll.u32 %v1157_v34, 23  ;;  %v1665_v16 = vadd.s32 4294967294, %v1044_v26 }
 0x362   : > { %v1159_v14 = vor.u32 4788187, %v1158_v13  ;;  %v1162_v18 = vcvt.s32.f32 %v1155_v10  ;;  %vm1666_vm8 = vcmp.lt.s32.totalorder %v1665_v16, 0  ;;  %v1198_v10 = vpop.permute.xlu1 %1197 }
 0x363   : > { %v1047_v44 = vsel %vm1666_vm8, 0, %v1665_v16 }
 0x364   : > { %v1160_v17 = vand.u32 2147483647, %v1159_v14  ;;  %v1048_v61 = vsub.s32 32, %v1047_v44  ;;  %v1052_v62 = vsub.s32 4294967266, %v1047_v44  ;;  %v1049_v22 = vshll.u32 %v1040_v43, %v1047_v44  ;;  %v1193_v14 = vpop.permute.xlu0 %1192 }
 0x366   : > { %v1163_v12 = vmul.f32 %v1162_v18, %v1160_v17  ;;  %v1050_v11 = vshrl.u32 %v1032_v2, %v1048_v61  ;;  %v1053_v23 = vadd.s32 127, %v1052_v62 }
 0x368   : > { %v1164_v20 = vxor.u32 2147483648, %v1163_v12  ;;  %v1051_v28 = vor.u32 %v1050_v11, %v1049_v22  ;;  %v1054_v31 = vshll.u32 %v1053_v23, 23 }
 0x36a   : > { %v1165_v25 = vsel %vm1082_vm9, %v1164_v20, %v1163_v12  ;;  %v1055_v35 = vor.u32 4788187, %v1054_v31  ;;  %v1058_v47 = vcvt.s32.f32 %v1051_v28 }
 0x36b   : > { %v1168_v29 = vsel %vm1081_vm10, %v2300_v58, %v1165_v25  ;;  %v1672_v58 = vld [vmem:[%s2542_s3 + $0x28] sm:$0xff] }
 0x36c   : > { %1835 = vcosq.f32 %v1168_v29  ;;  %v1056_v46 = vand.u32 2147483647, %v1055_v35 }
 0x36d   : > { %1837 = vsinq.f32 %v1168_v29 }
 0x36e   : > { %v1059_v33 = vmul.f32 %v1058_v47, %v1056_v46 }
 0x370   : > { %v1060_v39 = vxor.u32 2147483648, %v1059_v33 }
 0x372   : > { %v1061_v53 = vsel %vm978_vm11, %v1060_v39, %v1059_v33 }
 0x373   : > { %v1064_v50 = vsel %vm2376_vm12, %v2304_v63, %v1061_v53 }
 0x374   : > { %1839 = vcosq.f32 %v1064_v50 }
 0x375   : > { %1841 = vsinq.f32 %v1064_v50 }
 0x379   : > { %v1836_v41 = vpop.eup %1835 }
 0x37a   : > { %v1838_v48 = vpop.eup %1837  ;;  %v1180_v4 = vxor.u32 2147483648, %v1836_v41 }
 0x37b   : > { %v1177_v60 = vxor.u32 2147483648, %v1838_v48 }
 0x37c   : > { %v1181_v1 = vsel %vm1179_vm13, %v1180_v4, %v1838_v48 }
 0x37d   : > { %v1178_v21 = vsel %vm1176_vm14, %v1836_v41, %v1177_v60 }
 0x37e   : > { %v1182_v43 = vsel %vm1175_vm15, %v1178_v21, %v1181_v1 }
 0x37f   : > { %v1183_v3 = vsel %vm1172_vm0, nan, %v1182_v43 }
 0x380   : > { %1729 = vmatprep.subr.mxu1 %v1183_v3 }
 0x381   : > { %1730 = vmatpush3.msra.mxu1 %v1183_v3  ;;  %v1840_v5 = vpop.eup %1839 }
 0x382   : > { %v1842_v59 = vpop.eup %1841  ;;  %v1076_v56 = vxor.u32 2147483648, %v1840_v5 }
 0x383   : > { %v1073_v6 = vxor.u32 2147483648, %v1842_v59 }
 0x384   : > { %v1077_v7 = vsel %vm1075_vm1, %v1076_v56, %v1842_v59 }
 0x385   : > { %v1074_v8 = vsel %vm1072_vm3, %v1840_v5, %v1073_v6 }
 0x386   : > { %v1078_v34 = vsel %vm1071_vm4, %v1074_v8, %v1077_v7 }
 0x387   : > { %v1079_v9 = vsel %vm1068_vm5, nan, %v1078_v34 }
 0x388   : > { %1731 = vmatprep.subr.mxu1 %v1079_v9 }
 0x389   : > { %1732 = vmatpush3.msra.mxu1 %v1079_v9 }
 0x38a   : > { %1734 = vmatmul.mubr.msk.f32.vlgmr.msra.gmra.mxu1 %vm583_vm2, %v1672_v58 }
 0x44a   : > { %v1735_v13 = vpop.f32.mrf.mxu1 }
 0x44b   : > { %v2391_v26 = vadd.f32 %v1735_v13, %v1198_v10 }
 0x44c   : > { %v1272_v16 = vpop.f32.mrf.mxu1 }
 0x44d   : > { %v1385_v17 = vand.u32 2147483647, %v2391_v26  ;;  %v1388_v63 = vand.u32 2139095040, %v2391_v26  ;;  %v2395_v18 = vadd.f32 %v1272_v16, %v1193_v14  ;;  %vm1387_vm4 = vcmp.lt.s32.totalorder %v2391_v26, 0 }
 0x44f   : > { %v1389_v44 = vshrl.u32 %v1388_v63, 23  ;;  %v1392_v12 = vand.u32 8388607, %v1385_v17  ;;  %v1284_v2 = vand.u32 2139095040, %v2395_v18  ;;  %v1281_v62 = vand.u32 2147483647, %v2395_v18 }
 0x450   : > { %vm1386_vm5 = vcmp.le.f32.partialorder %v1385_v17, 0.7853982 }
 0x451   : > { %v1681_v61 = vadd.s32 4294967169, %v1389_v44  ;;  %v1285_v20 = vshrl.u32 %v1284_v2, 23  ;;  %v1393_v11 = vor.u32 8388608, %v1392_v12  ;;  %v1288_v24 = vand.u32 8388607, %v1281_v62 }
 0x453   : > { %v1395_v22 = vadd.s32 1, %v1681_v61  ;;  %v1677_v23 = vadd.s32 4294967169, %v1285_v20  ;;  %v2403_v35 = vshll.u32 %v1393_v11, 8  ;;  %v1289_v47 = vor.u32 8388608, %v1288_v24 }
 0x455   : > { %vm1396_vm2 = vcmp.gt.s32.totalorder %v1395_v22, 0  ;;  %v1291_v28 = vadd.s32 1, %v1677_v23  ;;  %v1329_v34 = vshll.u32 %v1289_v47, 8 }
 0x456   : > { %v1397_v25 = vsel %vm1396_vm2, %v1395_v22, 0  ;;  %vm1283_vm2 = vcmp.lt.s32.totalorder %v2395_v18, 0 }
 0x457   : > { %v1398_v31 = vshrl.u32 %v1397_v25, 5  ;;  %v1399_v29 = vand.u32 31, %v1397_v25  ;;  %vm1292_vm6 = vcmp.gt.s32.totalorder %v1291_v28, 0 }
 0x458   : > { %v1293_v40 = vsel %vm1292_vm6, %v1291_v28, 0  ;;  %vm2467_vm6 = vcmp.le.f32.partialorder %v1281_v62, 0.7853982 }
 0x459   : > { %v1400_v15 = vsub.s32 32, %v1399_v29  ;;  %v1402_v46 = vshll.u32 %v1917_v49, %v1399_v29  ;;  %v1405_v33 = vshll.u32 %v1918_v51, %v1399_v29  ;;  %v1408_v52 = vshll.u32 %v1919_v57, %v1399_v29 }
 0x45a   : > { %v1411_v39 = vshll.u32 %v1914_v37, %v1399_v29  ;;  %v1414_v30 = vshll.u32 %v1915_v42, %v1399_v29  ;;  %vm1417_vm7 = vcmp.lt.s32.totalorder %v1398_v31, 1  ;;  %vm1419_vm8 = vcmp.lt.s32.totalorder %v1398_v31, 3 }
 0x45b   : > { %v1403_v27 = vshrl.u32 %v1918_v51, %v1400_v15  ;;  %v1406_v53 = vshrl.u32 %v1919_v57, %v1400_v15  ;;  %v1409_v36 = vshrl.u32 %v1914_v37, %v1400_v15  ;;  %v1401_v50 = vshrl.u32 %v1917_v49, %v1400_v15 }
 0x45c   : > { %v1412_v55 = vshrl.u32 %v1915_v42, %v1400_v15  ;;  %v1415_v54 = vshrl.u32 %v1916_v45, %v1400_v15  ;;  %vm1420_vm9 = vcmp.lt.s32.totalorder %v1398_v31, 4  ;;  %v1295_v21 = vand.u32 31, %v1293_v40 }
 0x45d   : > { %v1404_v41 = vor.u32 %v1403_v27, %v1402_v46  ;;  %v1407_v48 = vor.u32 %v1406_v53, %v1405_v33  ;;  %v1410_v4 = vor.u32 %v1409_v36, %v1408_v52  ;;  %vm1418_vm10 = vcmp.lt.s32.totalorder %v1398_v31, 2 }
 0x45e   : > { %v1413_v60 = vor.u32 %v1412_v55, %v1411_v39  ;;  %v1416_v1 = vor.u32 %v1415_v54, %v1414_v30  ;;  %v1296_v6 = vsub.s32 32, %v1295_v21  ;;  %v1294_v13 = vshrl.u32 %v1293_v40, 5 }
 0x45f   : > { %v1421_v38 = vsel %vm1417_vm7, %v1401_v50, %v1404_v41  ;;  %v1422_v43 = vsel %vm1420_vm9, %v1410_v4, 2102212464  ;;  %v1425_v3 = vsel %vm1417_vm7, %v1404_v41, %v1407_v48  ;;  %v1429_v0 = vsel %vm1417_vm7, %v1407_v48, %v1410_v4 }
 0x460   : > { %v1423_v5 = vsel %vm1419_vm8, %v1407_v48, %v1422_v43  ;;  %v1426_v59 = vsel %vm1420_vm9, %v1413_v60, 920167782  ;;  %v1430_v56 = vsel %vm1420_vm9, %v1416_v1, 1326507024  ;;  %v1298_v12 = vshll.u32 %v1917_v49, %v1295_v21 }
 0x461   : > { %v1427_v7 = vsel %vm1419_vm8, %v1410_v4, %v1426_v59  ;;  %v1431_v8 = vsel %vm1419_vm8, %v1413_v60, %v1430_v56  ;;  %v1424_v9 = vsel %vm1418_vm10, %v1421_v38, %v1423_v5  ;;  %v1299_v2 = vshrl.u32 %v1918_v51, %v1296_v6 }
 0x462   : > { %v1428_v58 = vsel %vm1418_vm10, %v1425_v3, %v1427_v7  ;;  %v1432_v10 = vsel %vm1418_vm10, %v1429_v0, %v1431_v8  ;;  %v1301_v61 = vshll.u32 %v1918_v51, %v1295_v21  ;;  %v1302_v20 = vshrl.u32 %v1919_v57, %v1296_v6 }
 0x463   : > { %v2424_v14 = vmul.u32.u64.low %v2403_v35, %v1432_v10  ;;  %v2425_v16 = vmul.u32.u64.high %v2403_v35, %v1432_v10, %v2424_v14  ;;  %v2428_v63 = vmul.u32.u64.low %v2403_v35, %v1428_v58  ;;  %v2429_v44 = vmul.u32.u64.high %v2403_v35, %v1428_v58, %v2428_v63 }
 0x464   : > { %v1304_v22 = vshll.u32 %v1919_v57, %v1295_v21  ;;  %v1305_v11 = vshrl.u32 %v1914_v37, %v1296_v6  ;;  %v1307_v23 = vshll.u32 %v1914_v37, %v1295_v21  ;;  %v1308_v24 = vshrl.u32 %v1915_v42, %v1296_v6 }
 0x465   : > { %v1300_v25 = vor.u32 %v1299_v2, %v1298_v12  ;;  %v1303_v28 = vor.u32 %v1302_v20, %v1301_v61  ;;  %v1310_v31 = vshll.u32 %v1915_v42, %v1295_v21  ;;  %v1311_v29 = vshrl.u32 %v1916_v45, %v1296_v6 }
 0x466   : > { %v1440_v15 = vmul.u32 %v2403_v35, %v1424_v9  ;;  %vm1442_vm11 = vc.u32 %v2425_v16, %v2428_v63  ;;  %v1443_v51 = vadd.s32 1, %v2429_v44  ;;  %v1306_v57 = vor.u32 %v1305_v11, %v1304_v22 }
 0x467   : > { %v1297_v46 = vshrl.u32 %v1917_v49, %v1296_v6  ;;  %v1309_v47 = vor.u32 %v1308_v24, %v1307_v23  ;;  %v1312_v37 = vor.u32 %v1311_v29, %v1310_v31  ;;  %vm1313_vm12 = vcmp.lt.s32.totalorder %v1294_v13, 1 }
 0x468   : > { %v1444_v33 = vsel %vm1442_vm11, %v1443_v51, %v2429_v44  ;;  %vm1315_vm13 = vcmp.lt.s32.totalorder %v1294_v13, 3  ;;  %vm1316_vm14 = vcmp.lt.s32.totalorder %v1294_v13, 4  ;;  %v1321_v42 = vsel %vm1313_vm12, %v1300_v25, %v1303_v28 }
 0x469   : > { %v1445_v52 = vadd.s32 %v1444_v33, %v1440_v15  ;;  %v1318_v45 = vsel %vm1316_vm14, %v1306_v57, 2102212464  ;;  %v1322_v39 = vsel %vm1316_vm14, %v1309_v47, 920167782  ;;  %v1325_v35 = vsel %vm1313_vm12, %v1303_v28, %v1306_v57 }
 0x46a   : > { %vm1314_vm15 = vcmp.lt.s32.totalorder %v1294_v13, 2  ;;  %v1317_v30 = vsel %vm1313_vm12, %v1297_v46, %v1300_v25  ;;  %v1323_v27 = vsel %vm1315_vm13, %v1306_v57, %v1322_v39  ;;  %v1326_v53 = vsel %vm1316_vm14, %v1312_v37, 1326507024 }
 0x46b   : > { %v1446_v36 = vadd.s32 536870912, %v1445_v52  ;;  %v1319_v50 = vsel %vm1315_vm13, %v1303_v28, %v1318_v45  ;;  %v1324_v55 = vsel %vm1314_vm15, %v1321_v42, %v1323_v27  ;;  %v1327_v49 = vsel %vm1315_vm13, %v1309_v47, %v1326_v53 }
 0x46c   : > { %v1328_v54 = vsel %vm1314_vm15, %v1325_v35, %v1327_v49  ;;  %v2448_v41 = vmul.u32.u64.low %v1329_v34, %v1324_v55  ;;  %v2449_v48 = vmul.u32.u64.high %v1329_v34, %v1324_v55, %v2448_v41  ;;  %v1320_v1 = vsel %vm1314_vm15, %v1317_v30, %v1319_v50 }
 0x46d   : > { %v1447_v4 = vshrl.u32 %v1446_v36, 30  ;;  %v2451_v40 = vmul.u32.u64.low %v1329_v34, %v1328_v54  ;;  %v2452_v60 = vmul.u32.u64.high %v1329_v34, %v1328_v54, %v2451_v40  ;;  %v1336_v3 = vmul.u32 %v1329_v34, %v1320_v1 }
 0x46e   : > { %v1339_v38 = vadd.s32 1, %v2449_v48  ;;  %v1441_v14 = vadd.s32 %v2428_v63, %v2425_v16  ;;  %vm1477_vm10 = vweird.f32 %v2391_v26  ;;  %vm1373_vm14 = vweird.f32 %v2395_v18 }
 0x46f   : > { %v1448_v21 = vshll.u32 %v1447_v4, 30  ;;  %vm1338_vm0 = vc.u32 %v2452_v60, %v2448_v41  ;;  %v1337_v57 = vadd.s32 %v2448_v41, %v2452_v60  ;;  %v1471_v42 = vsub.s32 4, %v1447_v4 }
 0x470   : > { %v1340_v0 = vsel %vm1338_vm0, %v1339_v38, %v2449_v48  ;;  %vm1495_vm15 = vcmask 7168  }
 0x471   : > { %v1449_v43 = vsub.s32 %v1445_v52, %v1448_v21  ;;  %v1341_v59 = vadd.s32 %v1340_v0, %v1336_v3  ;;  %v1472_v27 = vsel %vm1387_vm4, %v1471_v42, %v1447_v4 }
 0x472   : > { %v1474_v55 = vsel %vm1386_vm5, 0, %v1472_v27 }
 0x473   : > { %v1451_v5 = vsub.s32 0, %v1449_v43  ;;  %v1342_v6 = vadd.s32 536870912, %v1341_v59  ;;  %v1478_v54 = vadd.s32 3, %v1474_v55 }
 0x475   : > { %v1682_v56 = vmin.u32 %v1451_v5, %v1449_v43  ;;  %v1343_v8 = vshrl.u32 %v1342_v6, 30  ;;  %v1479_v40 = vand.u32 3, %v1478_v54 }
 0x477   : > { %v1453_v7 = vclz %v1682_v56  ;;  %v1344_v58 = vshll.u32 %v1343_v8, 30  ;;  %v1367_v41 = vsub.s32 4, %v1343_v8  ;;  %vm1484_vm7 = vcmp.eq.s32.totalorder %v1479_v40, 2 }
 0x478   : > { %vm1481_vm8 = vcmp.eq.s32.totalorder %v1479_v40, 0  ;;  %vm1480_vm9 = vcmp.lt.s32.totalorder %v1479_v40, 2 }
 0x479   : > { %v1683_v9 = vadd.s32 4294967294, %v1453_v7  ;;  %v1345_v10 = vsub.s32 %v1341_v59, %v1344_v58  ;;  %v1368_v60 = vsel %vm1283_vm2, %v1367_v41, %v1343_v8 }
 0x47b   : > { %vm1684_vm1 = vcmp.lt.s32.totalorder %v1683_v9, 0  ;;  %v1347_v12 = vsub.s32 0, %v1345_v10 }
 0x47c   : > { %v1456_v13 = vsel %vm1684_vm1, 0, %v1683_v9 }
 0x47d   : > { %v1457_v44 = vsub.s32 32, %v1456_v13  ;;  %v1461_v34 = vsub.s32 4294967266, %v1456_v13  ;;  %v1458_v2 = vshll.u32 %v1449_v43, %v1456_v13  ;;  %v1678_v22 = vmin.u32 %v1347_v12, %v1345_v10 }
 0x47e   : > { %v1370_v43 = vsel %vm2467_vm6, 0, %v1368_v60 }
 0x47f   : > { %v1459_v61 = vshrl.u32 %v1441_v14, %v1457_v44  ;;  %v1462_v20 = vadd.s32 127, %v1461_v34  ;;  %v1349_v24 = vclz %v1678_v22  ;;  %v1374_v5 = vadd.s32 3, %v1370_v43 }
 0x481   : > { %v1460_v11 = vor.u32 %v1459_v61, %v1458_v2  ;;  %v1463_v23 = vshll.u32 %v1462_v20, 23  ;;  %v1679_v28 = vadd.s32 4294967294, %v1349_v24  ;;  %v1375_v7 = vand.u32 3, %v1374_v5 }
 0x483   : > { %v1464_v25 = vor.u32 4788187, %v1463_v23  ;;  %v1467_v29 = vcvt.s32.f32 %v1460_v11  ;;  %vm1680_vm3 = vcmp.lt.s32.totalorder %v1679_v28, 0  ;;  %vm1380_vm11 = vcmp.eq.s32.totalorder %v1375_v7, 2 }
 0x484   : > { %v1352_v15 = vsel %vm1680_vm3, 0, %v1679_v28  ;;  %vm1377_vm12 = vcmp.eq.s32.totalorder %v1375_v7, 0  ;;  %vm1376_vm13 = vcmp.lt.s32.totalorder %v1375_v7, 2 }
 0x485   : > { %v1465_v31 = vand.u32 2147483647, %v1464_v25  ;;  %v1353_v16 = vsub.s32 32, %v1352_v15  ;;  %v1357_v63 = vsub.s32 4294967266, %v1352_v15  ;;  %v1354_v47 = vshll.u32 %v1345_v10, %v1352_v15 }
 0x487   : > { %v1468_v51 = vmul.f32 %v1467_v29, %v1465_v31  ;;  %v1355_v37 = vshrl.u32 %v1337_v57, %v1353_v16  ;;  %v1358_v33 = vadd.s32 127, %v1357_v63 }
 0x489   : > { %v1469_v46 = vxor.u32 2147483648, %v1468_v51  ;;  %v1356_v45 = vor.u32 %v1355_v37, %v1354_v47  ;;  %v1359_v39 = vshll.u32 %v1358_v33, 23 }
 0x48b   : > { %v1470_v52 = vsel %vm1387_vm4, %v1469_v46, %v1468_v51  ;;  %v1360_v30 = vor.u32 4788187, %v1359_v39  ;;  %v1363_v36 = vcvt.s32.f32 %v1356_v45 }
 0x48c   : > { %v1473_v35 = vsel %vm1386_vm5, %v2391_v26, %v1470_v52 }
 0x48d   : > { %1843 = vcosq.f32 %v1473_v35  ;;  %v1361_v53 = vand.u32 2147483647, %v1360_v30 }
 0x48e   : > { %1845 = vsinq.f32 %v1473_v35 }
 0x48f   : > { %v1364_v50 = vmul.f32 %v1363_v36, %v1361_v53 }
 0x491   : > { %v1365_v49 = vxor.u32 2147483648, %v1364_v50 }
 0x493   : > { %v1366_v48 = vsel %vm1283_vm2, %v1365_v49, %v1364_v50 }
 0x494   : > { %v1369_v4 = vsel %vm2467_vm6, %v2395_v18, %v1366_v48 }
 0x495   : > { %1847 = vcosq.f32 %v1369_v4 }
 0x496   : > { %1849 = vsinq.f32 %v1369_v4 }
 0x49a   : > { %v1844_v1 = vpop.eup %1843 }
 0x49b   : > { %v1846_v21 = vpop.eup %1845  ;;  %v1485_v38 = vxor.u32 2147483648, %v1844_v1 }
 0x49c   : > { %v1482_v3 = vxor.u32 2147483648, %v1846_v21 }
 0x49d   : > { %v1486_v62 = vsel %vm1484_vm7, %v1485_v38, %v1846_v21 }
 0x49e   : > { %v1483_v0 = vsel %vm1481_vm8, %v1844_v1, %v1482_v3 }
 0x49f   : > { %v1487_v59 = vsel %vm1480_vm9, %v1483_v0, %v1486_v62 }
 0x4a0   : > { %v1488_v56 = vsel %vm1477_vm10, nan, %v1487_v59 }
 0x4a1   : > { %v1490_v6 = vadd.f32 %v1488_v56, %v2275_v19 }
 0x4a2   : > { %v1848_v8 = vpop.eup %1847 }
 0x4a3   : > { %1493 = vadd.xlane.f32.xlu1 %v1490_v6  ;;  %v1850_v9 = vpop.eup %1849  ;;  %v1381_v58 = vxor.u32 2147483648, %v1848_v8 }
 0x4a4   : > { %v1378_v10 = vxor.u32 2147483648, %v1850_v9 }
 0x4a5   : > { %v1382_v13 = vsel %vm1380_vm11, %v1381_v58, %v1850_v9 }
 0x4a6   : > { %v1379_v14 = vsel %vm1377_vm12, %v1848_v8, %v1378_v10 }
 0x4a7   : > { %v1383_v26 = vsel %vm1376_vm13, %v1379_v14, %v1382_v13 }
 0x4a8   : > { %v1384_v44 = vsel %vm1373_vm14, nan, %v1383_v26 }
 0x4a9   : > { %v1489_v34 = vadd.f32 %v1384_v44, %v2288_v32 }
 0x4ab   : > { %1491 = vadd.xlane.f32.xlu0 %v1489_v34 }
 0x52c   : > { %v1494_v19 = vpop.xlane.xlu1 %1493 }
 0x52d   : > { %1497 = vst.msk [vmem:[%s259_s12 + $0x8] sm:$0xff] %vm1495_vm15, %v1494_v19 }
 0x531   : > { %1503 = sbr.rel (%p1686_p11) target bundleno = 1485 (0x5cd), region = 44 }
 0x534   : > { %v1492_v12 = vpop.xlane.xlu0 %1491 }
 0x535   : > { %1496 = vst.msk [vmem:[%s259_s12] sm:$0xff] %vm1495_vm15, %v1492_v12 }
 0x536   : > { %v1504_v18 = vlaneseq  ;;  %v1507_v2 = vstv %s1693_s26 }
 0x538   : > { %v1505_v32 = vand.u32 127, %v1504_v18 }
 0x53a   : > { %v1508_v61 = vadd.s32 %v1507_v2, %v1505_v32 }
 0x53c   : > { %vm1509_vm0 = vcmp.lt.s32.totalorder %v1508_v61, 300 }
 0x53d   : > { %v1512_v20 = vsel %vm1509_vm0, %v1489_v34, 0.0  ;;  %v1513_v22 = vsel %vm1509_vm0, %v1490_v6, 0.0 }
 0x53e   : > { %1514 = vadd.xlane.f32.xlu0 %v1512_v20 }
 0x542   : > { %1516 = vadd.xlane.f32.xlu0 %v1513_v22 }
 0x5c7   : > { %v1515_v11 = vpop.xlane.xlu0 %1514 }
 0x5c8   : > { %1518 = vst.msk [vmem:[%s259_s12] sm:$0xff] %vm1495_vm15, %v1515_v11 }
 0x5cb   : > { %v1517_v23 = vpop.xlane.xlu0 %1516 }
 0x5cc   : > { %1519 = vst.msk [vmem:[%s259_s12 + $0x8] sm:$0xff] %vm1495_vm15, %v1517_v23 }
 0x5cd PF: > { %s2492_s15 = scalar_lea.hbm %s2545_s6, %s1693_s26  ;;  %s1541_s16 = sshll.u32 %s2277_s14, 4  ;;  %s2495_s16 = int_to_ptr.vmem [resolvable:$true] %s1541_s16 }
 0x5ce   : > { %s2499_s17 = scalar_lea.sflag [#allocation3], %s248_s11  ;;  %s1851_s18 = scalar_lea.vmem %s2495_s16, 256 }
 0x5cf   : > { %p1852_p12 = scmp.ne.s32.totalorder %s2495_s16, %s1851_s18  ;;  %s1920_s19 = smov [#allocation2]  }
 0x5d0   : > { %s1855_s20 = sshll.u32 %s1920_s19, 4  ;;  %s1856_s20 = int_to_ptr.vmem [resolvable:$false] %s1855_s20 }
 0x5d1   : > { %p1853_p13 = pnand %p1852_p12, %p1997_p5  ;;  %s1857_s28 = scalar_lea.vmem %s1856_s20, 512 }
 0x5d2   : > { %p1858_p1 = scmp.lt.s32.totalorder %s2495_s16, %s1856_s20  ;;  %p1859_p2 = scmp.lt.s32.totalorder %s1857_s28, %s1851_s18 }
 0x5d3   : > { %p1854_p0 = pneg %p1853_p13 }
 0x5d4   : > { %p1860_p3 = por %p1859_p2, %p1858_p1 }
 0x5d6   : > { %p1861_p4 = pnand %p1860_p3, %p1854_p0 }
 0x5d8   : > { %1864 = shalt.err (!%p1861_p4)
}
 0x5d9   : > { %s1865_s11 = scalar_lea.hbm %s2492_s15, 256  ;;  %s1869_s29 = scalar_lea.hbm %s2545_s6, 768 }
 0x5da   : > { %p1866_p7 = scmp.ne.s32.totalorder %s2492_s15, %s1865_s11  ;;  %p1870_p10 = scmp.lt.s32.totalorder %s2492_s15, %s2545_s6 }
 0x5db   : > { %p1871_p11 = scmp.lt.s32.totalorder %s1869_s29, %s1865_s11 }
 0x5dc   : > { %p1867_p8 = pnand %p1866_p7, %p1997_p5 }
 0x5dd   : > { %p1872_p12 = por %p1871_p11, %p1870_p10 }
 0x5de   : > { %p1868_p9 = pneg %p1867_p8 }
 0x5e0   : > { %p1873_p13 = pnand %p1872_p12, %p1868_p9 }
 0x5e2   : > { %1876 = shalt.err (!%p1873_p13)
}
 0x5e3   : > { %s1921_s12 = smov 128   ;;  %s1922_s25 = smov 384  }
 0x5e4   : > { %s1923_s13 = smov 8  }
 0x5e5   : > { %1768 = dma.vmem_to_hbm [thread:$0]  (%p1997_p5), %s2495_s16, 256, %s2492_s15, %s2499_s17, %s1921_s12, %s1922_s25, %s1923_s13  }
 0x5e6 PF: > { %p1774_p0 = scmp.ge.s32.totalorder %s1911_s24, 2  ;;  %s1564_s18 = sand.u32 1, %s1899_s21  }
 0x5e7   : > { %s1565_s19 = scalar_lea.sflag [#allocation3], %s1564_s18 }
 0x5e8   : > { %p1771_p1 = pnand %p1774_p0, %p2001_p6 }
 0x5ea   : > { %p1772_p2 = pneg %p1771_p1 }
 0x5ec   : > { %1894 = dma.done.wait (%p1772_p2), %s1565_s19, 256  }
 0x5ed   : > { %1896 = vsyncadd (%p1772_p2), %s1565_s19, 4294967040  ;;  %p17_p3 = scmp.ge.s32.totalorder %s1984_s27, 5   ;;  %s2556_s21 = smov %s1903_s22 }
 0x5ee   : > { %s2557_s22 = smov %s1907_s23  ;;  %s2558_s23 = smov %s1995_s30 }
 0x5ef   : > { %s2559_s24 = smov %s1984_s27  ;;  %19 = sbr.rel (!%p17_p3) target bundleno = 3 (0x3), region = 95 }
 0x5f4   :  { %1570 = vsyncpa [#allocation3], 1 }
 0x5f5   :  { %1572 = vsyncpa [#allocation3 + $0x1], 1 }

</bundles_post_ra>
